<compile_context>
chip_gen: v6e
topology: v6e:2x2x1
jax: 0.10.0
libtpu: 0.0.40
codegen_flags: <defaults>
</compile_context>

<pallas_src>
import jax
import jax.numpy as jnp
from jax.experimental import pallas as pl
from jax.experimental.pallas import tpu as pltpu


def bottleneck_kernel(x_ref, xu_ref, xd_ref,
                      w1_ref, b1_ref, w2_ref, b2_ref, w3_ref, b3_ref,
                      o_ref):
    """One (image, row-tile) per grid step; everything pixel-major (M, C).

    x_ref : (TH*W, Cin)  f32  tile pixels (rows t*TH .. t*TH+TH-1)
    xu_ref: (W, Cin)     f32  row above the tile (zeros for the first tile)
    xd_ref: (W, Cin)     f32  row below the tile (zeros for the last tile)
    w1_ref: (Cin, P)     bf16 conv1 1x1, BN1 scale folded
    w2_ref: (9*P, P)     bf16 conv2 3x3 flattened HWIO, BN2 scale folded
    w3_ref: (P, Cout)    bf16 conv3 1x1, BN3 scale folded
    b*_ref: (1, C)       f32  folded BN biases
    o_ref : (TH*W, Cout) f32
    """
    MT, Cin = x_ref.shape          # MT = TH*W
    W = xu_ref.shape[0]
    P = w1_ref.shape[1]
    cdt = w1_ref.dtype             # bf16 compute dtype for MXU inputs

    # ---- conv1 (1x1) + bn1 + relu over [pad, up halo, tile, down halo, pad] ----
    # One MXU matmul over every row the 3x3 conv will need.  The two extra
    # pad rows make every later tap slice in-bounds; their values only land on
    # column-masked positions so relu(b1) garbage there is harmless.
    zrow = jnp.zeros((1, Cin), cdt)
    x_ext = jnp.concatenate(
        [zrow, xu_ref[...].astype(cdt), x_ref[...].astype(cdt),
         xd_ref[...].astype(cdt), zrow], axis=0)                 # (ME, Cin) bf16
    y1 = jnp.dot(x_ext, w1_ref[...], preferred_element_type=jnp.float32)
    y1 = jnp.maximum(y1 + b1_ref[...], 0.0).astype(cdt)          # (ME, P) bf16

    # ---- conv2 (3x3, stride 1, pad 1) + bn2 + relu via bf16 im2col ----
    # For output pixel m (= local_row*W + col), tap (kh, kw) lives at padded
    # index m + kh*W + kw of y1: each tap is a sublane-offset slice, channels
    # stay on lanes.  Column wrap (col 0 for kw=0, col W-1 for kw=2) is masked.
    col = jax.lax.broadcasted_iota(jnp.int32, (MT, 1), 0) % W
    mask_l = col > 0
    mask_r = col < (W - 1)
    zero = jnp.zeros((MT, P), cdt)
    taps = []
    for kh in range(3):
        for kw in range(3):
            s = kh * W + kw
            tap = y1[s:s + MT, :]                                # (MT, P) bf16
            if kw == 0:
                tap = jnp.where(mask_l, tap, zero)
            elif kw == 2:
                tap = jnp.where(mask_r, tap, zero)
            taps.append(tap)
    slab = jnp.concatenate(taps, axis=-1)                        # (MT, 9P) bf16
    y2 = jnp.dot(slab, w2_ref[...], preferred_element_type=jnp.float32)
    y2 = jnp.maximum(y2 + b2_ref[...], 0.0)

    # ---- conv3 (1x1) + bn3 ----
    y3 = jnp.dot(y2.astype(cdt), w3_ref[...],
                 preferred_element_type=jnp.float32)
    y3 = y3 + b3_ref[...]

    # ---- identity residual + relu: re-read the resident input block ----
    o_ref[...] = jnp.maximum(y3 + x_ref[...], 0.0).astype(o_ref.dtype)


def _pick_row_tile(H):
    for th in (8, 7, 4, 2, 1):
        if H % th == 0:
            return th
    return 1


def _vmem_limit_bytes(TH, W, Cin, P, Cout):
    """Explicit per-kernel VMEM budget (review: size it; don't rely on defaults)."""
    f32, bf16 = 4, 2
    MT = TH * W
    ME = MT + 2 * W + 2
    blocks = 2 * (MT * Cin * f32 + 2 * W * Cin * f32 + MT * Cout * f32)  # 2x buffered
    weights = 2 * ((Cin * P + 9 * P * P + P * Cout) * bf16 + (2 * P + Cout) * f32)
    interm = (ME * Cin * bf16 + ME * P * (f32 + bf16)      # x_ext, y1 (f32+bf16)
              + 2 * MT * 9 * P * bf16                      # taps + slab
              + MT * P * f32 + 2 * MT * Cout * f32)        # y2, y3/out
    est = blocks + weights + interm
    # 4x headroom for compiler scratch; clamp so it fits every generation
    # (v7x physical VMEM is 64 MiB).
    return int(min(max(4 * est, 16 << 20), 64 << 20))


def bottleneck_forward(x_nchw, prep_params, row_tile=None):
    """x_nchw: (N, Cin, H, W) f32.  prep_params: folded bf16 weights + f32 biases."""
    w1, b1, w2, b2, w3, b3 = prep_params
    N, Cin, H, W = x_nchw.shape
    P = w1.shape[1]
    Cout = w3.shape[1]
    assert Cin == Cout, ("identity shortcut requires in_planes == planes*expansion; "
                         "stride>1 / projection downsample not implemented")

    TH = row_tile or _pick_row_tile(H)
    assert H % TH == 0
    nT = H // TH
    assert W % 8 == 0 or nT == 1, "row tiling needs W % 8 == 0 (sublane tiling)"

    # NCHW -> NHWC once at the block boundary (keep NHWC across stacked blocks).
    x = jnp.transpose(x_nchw, (0, 2, 3, 1)).astype(jnp.float32)   # (N, H, W, Cin)

    # Pixel-major slab + 1-row halos per row tile (zeros at the image border).
    x_slab = x.reshape(N, H * W, Cin)
    zrow = jnp.zeros((N, 1, W, Cin), jnp.float32)
    up = jnp.concatenate([zrow, x[:, TH - 1:H - 1:TH]], axis=1)   # (N, nT, W, Cin)
    dn = jnp.concatenate([x[:, TH:H:TH], zrow], axis=1)           # (N, nT, W, Cin)
    up = up.reshape(N, nT * W, Cin)
    dn = dn.reshape(N, nT * W, Cin)

    out_slab = pl.pallas_call(
        bottleneck_kernel,
        out_shape=jax.ShapeDtypeStruct((N, H * W, Cout), jnp.float32),
        grid_spec=pltpu.PrefetchScalarGridSpec(
            num_scalar_prefetch=0,
            grid=(N, nT),
            in_specs=[
                pl.BlockSpec((None, TH * W, Cin), lambda n, t: (n, t, 0)),
                pl.BlockSpec((None, W, Cin), lambda n, t: (n, t, 0)),
                pl.BlockSpec((None, W, Cin), lambda n, t: (n, t, 0)),
                pl.BlockSpec((Cin, P), lambda n, t: (0, 0)),
                pl.BlockSpec((1, P), lambda n, t: (0, 0)),
                pl.BlockSpec((9 * P, P), lambda n, t: (0, 0)),
                pl.BlockSpec((1, P), lambda n, t: (0, 0)),
                pl.BlockSpec((P, Cout), lambda n, t: (0, 0)),
                pl.BlockSpec((1, Cout), lambda n, t: (0, 0)),
            ],
            out_specs=pl.BlockSpec((None, TH * W, Cout), lambda n, t: (n, t, 0)),
        ),
        compiler_params=pltpu.CompilerParams(
            dimension_semantics=("parallel", "parallel"),
            vmem_limit_bytes=_vmem_limit_bytes(TH, W, Cin, P, Cout)),
    )(x_slab, up, dn, w1, b1, w2, b2, w3, b3)

    out = out_slab.reshape(N, H, W, Cout)
    return jnp.transpose(out, (0, 3, 1, 2))                      # NHWC -> NCHW


# --------------------------------------------------------------------------
# Parameter construction (mimics the PyTorch module) and host-side folding.
# --------------------------------------------------------------------------
def init_raw_params(key, in_planes, planes, expansion=4):
    """PyTorch-like raw params: conv weights (OIHW) + BN (gamma,beta,mean,var)."""
    ks = jax.random.split(key, 15)
    w1 = 0.1 * jax.random.normal(ks[0], (planes, in_planes, 1, 1), jnp.float32)
    w2 = 0.1 * jax.random.normal(ks[1], (planes, planes, 3, 3), jnp.float32)
    w3 = 0.1 * jax.random.normal(
        ks[2], (planes * expansion, planes, 1, 1), jnp.float32)

    def bn(kg, kb, km, kv, c):
        gamma = 1.0 + 0.1 * jax.random.normal(kg, (c,), jnp.float32)
        beta = 0.1 * jax.random.normal(kb, (c,), jnp.float32)
        mean = 0.1 * jax.random.normal(km, (c,), jnp.float32)
        var = jnp.abs(jax.random.normal(kv, (c,), jnp.float32)) + 0.5
        return gamma, beta, mean, var

    bn1 = bn(ks[3], ks[4], ks[5], ks[6], planes)
    bn2 = bn(ks[7], ks[8], ks[9], ks[10], planes)
    bn3 = bn(ks[11], ks[12], ks[13], ks[14], planes * expansion)
    return (w1, bn1, w2, bn2, w3, bn3)


def prepare_params(raw, eps=1e-5, compute_dtype=jnp.bfloat16):
    """Fold BN scales into conv weights, flatten conv2 for im2col, cast to bf16."""
    w1, bn1, w2, bn2, w3, bn3 = raw

    def fold(gamma, beta, mean, var):
        scale = gamma / jnp.sqrt(var + eps)
        bias = beta - mean * scale
        return scale, bias

    s1, b1 = fold(*bn1)
    s2, b2 = fold(*bn2)
    s3, b3 = fold(*bn3)

    P = w2.shape[0]
    # conv1: OIHW (P, Cin, 1, 1) -> (Cin, P), BN1 scale on output channels.
    w1m = (w1[:, :, 0, 0].T * s1[None, :]).astype(compute_dtype)
    # conv2: OIHW (P, P, 3, 3) -> HWIO (3,3,P,P) -> scale -> (9P, P);
    # row index = (kh*3 + kw)*P + cin, matching the kernel's tap ordering.
    w2h = jnp.transpose(w2, (2, 3, 1, 0)) * s2[None, None, None, :]
    w2m = w2h.reshape(9 * P, P).astype(compute_dtype)
    # conv3: OIHW (Cout, P, 1, 1) -> (P, Cout), BN3 scale on output channels.
    w3m = (w3[:, :, 0, 0].T * s3[None, :]).astype(compute_dtype)

    return (w1m, b1.reshape(1, -1), w2m, b2.reshape(1, -1),
            w3m, b3.reshape(1, -1))


# --------------------------------------------------------------------------
# References.
# --------------------------------------------------------------------------
def reference_forward_prepared(x_nchw, prep_params):
    """Pure-JAX reference with the SAME math as the kernel (bf16 matmul inputs)."""
    w1, b1, w2, b2, w3, b3 = prep_params
    x = jnp.transpose(x_nchw, (0, 2, 3, 1)).astype(jnp.float32)
    N, H, W, Cin = x.shape
    P = w1.shape[1]
    Cout = w3.shape[1]

    y = jnp.dot(x.reshape(-1, Cin).astype(w1.dtype), w1,
                preferred_element_type=jnp.float32)
    y = jnp.maximum(y + b1, 0.0).reshape(N, H, W, P)

    w2h = w2.reshape(3, 3, P, P)
    y = jax.lax.conv_general_dilated(
        y.astype(w2.dtype), w2h, window_strides=(1, 1), padding='SAME',
        dimension_numbers=('NHWC', 'HWIO', 'NHWC'),
        preferred_element_type=jnp.float32)
    y = jnp.maximum(y + b2.reshape(P), 0.0)

    y = jnp.dot(y.reshape(-1, P).astype(w3.dtype), w3,
                preferred_element_type=jnp.float32)
    y = (y + b3).reshape(N, H, W, Cout)
    y = jnp.maximum(y + x, 0.0)
    return jnp.transpose(y, (0, 3, 1, 2))


def reference_forward_torchlike(x_nchw, raw_params, eps=1e-5):
    """Module-faithful f32 reference: conv -> BN(eval) -> relu chain + residual."""
    w1, bn1, w2, bn2, w3, bn3 = raw_params
    x = jnp.transpose(x_nchw, (0, 2, 3, 1)).astype(jnp.float32)

    def bn(y, p):
        gamma, beta, mean, var = p
        return (y - mean) / jnp.sqrt(var + eps) * gamma + beta

    y = jnp.einsum('nhwc,oc->nhwo', x, w1[:, :, 0, 0])
    y = jnp.maximum(bn(y, bn1), 0.0)
    y = jax.lax.conv_general_dilated(
        y, jnp.transpose(w2, (2, 3, 1, 0)), window_strides=(1, 1),
        padding='SAME', dimension_numbers=('NHWC', 'HWIO', 'NHWC'))
    y = jnp.maximum(bn(y, bn2), 0.0)
    y = jnp.einsum('nhwc,oc->nhwo', y, w3[:, :, 0, 0])
    y = bn(y, bn3)
    y = jnp.maximum(y + x, 0.0)
    return jnp.transpose(y, (0, 3, 1, 2))


if __name__ == "__main__":
    key = jax.random.PRNGKey(0)
    k_x, k_p = jax.random.split(key)

    planes = 4
    expansion = 4
    in_planes = planes * expansion     # 16: identity residual (downsample=None)
    N, H, W = 2, 16, 16

    x = jax.random.normal(k_x, (N, in_planes, H, W), jnp.float32)   # NCHW
    raw_params = init_raw_params(k_p, in_planes, planes, expansion)
    prep_params = prepare_params(raw_params)

    out = jax.block_until_ready(bottleneck_forward(x, prep_params))
    assert out.shape == (N, planes * expansion, H, W), out.shape

    # Tight check: same (bf16-input, f32-accumulate) math in pure JAX.
    ref_tight = reference_forward_prepared(x, prep_params)
    assert jnp.allclose(out, ref_tight, atol=2e-3, rtol=2e-3), (
        float(jnp.max(jnp.abs(out - ref_tight))))

    # Loose check: module-faithful full-f32 reference (bf16 rounding tolerance).
    ref_loose = reference_forward_torchlike(x, raw_params)
    assert jnp.allclose(out, ref_loose, atol=5e-2, rtol=5e-2), (
        float(jnp.max(jnp.abs(out - ref_loose))))

    print("KERNEL_OK")
</pallas_src>

<mosaic_0001>
module attributes {stable_mosaic.version = 11 : i64} {
  func.func @bottleneck_kernel(%arg0: i32, %arg1: i32, %arg2: memref<1x128x16xf32, #tpu.memory_space<vmem>>, %arg3: memref<1x16x16xf32, #tpu.memory_space<vmem>>, %arg4: memref<1x16x16xf32, #tpu.memory_space<vmem>>, %arg5: memref<16x4xbf16, #tpu.memory_space<vmem>>, %arg6: memref<1x4xf32, #tpu.memory_space<vmem>>, %arg7: memref<36x4xbf16, #tpu.memory_space<vmem>>, %arg8: memref<1x4xf32, #tpu.memory_space<vmem>>, %arg9: memref<4x16xbf16, #tpu.memory_space<vmem>>, %arg10: memref<1x16xf32, #tpu.memory_space<vmem>>, %arg11: memref<1x128x16xf32, #tpu.memory_space<vmem>>) attributes {dimension_semantics = [#tpu.dimension_semantics<parallel>, #tpu.dimension_semantics<parallel>], iteration_bounds = array<i64: 2, 2>, scalar_prefetch = 0 : i64, scratch_operands = 0 : i64, tpu.core_type = #tpu.core_type<tc>, window_params = [{transform_indices = @transform_0, window_bounds = array<i64: 1, 128, 16>}, {transform_indices = @transform_1, window_bounds = array<i64: 1, 16, 16>}, {transform_indices = @transform_2, window_bounds = array<i64: 1, 16, 16>}, {pipeline_mode = #tpu.pipeline_mode<synchronous>, transform_indices = @transform_3, window_bounds = array<i64: 16, 4>}, {pipeline_mode = #tpu.pipeline_mode<synchronous>, transform_indices = @transform_4, window_bounds = array<i64: 1, 4>}, {pipeline_mode = #tpu.pipeline_mode<synchronous>, transform_indices = @transform_5, window_bounds = array<i64: 36, 4>}, {pipeline_mode = #tpu.pipeline_mode<synchronous>, transform_indices = @transform_6, window_bounds = array<i64: 1, 4>}, {pipeline_mode = #tpu.pipeline_mode<synchronous>, transform_indices = @transform_7, window_bounds = array<i64: 4, 16>}, {pipeline_mode = #tpu.pipeline_mode<synchronous>, transform_indices = @transform_8, window_bounds = array<i64: 1, 16>}, {transform_indices = @transform_9, window_bounds = array<i64: 1, 128, 16>}]} {
    %cst = arith.constant 0.000000e+00 : bf16
    %0 = vector.broadcast %cst : bf16 to vector<1x16xbf16>
    %c0 = arith.constant 0 : index
    %c0_0 = arith.constant 0 : index
    %c0_1 = arith.constant 0 : index
    %1 = vector.load %arg3[%c0, %c0_0, %c0_1] : memref<1x16x16xf32, #tpu.memory_space<vmem>>, vector<1x16x16xf32>
    %2 = vector.shape_cast %1 : vector<1x16x16xf32> to vector<16x16xf32>
    %3 = arith.truncf %2 : vector<16x16xf32> to vector<16x16xbf16>
    %c0_2 = arith.constant 0 : index
    %c0_3 = arith.constant 0 : index
    %c0_4 = arith.constant 0 : index
    %4 = vector.load %arg2[%c0_2, %c0_3, %c0_4] : memref<1x128x16xf32, #tpu.memory_space<vmem>>, vector<1x128x16xf32>
    %5 = vector.shape_cast %4 : vector<1x128x16xf32> to vector<128x16xf32>
    %6 = arith.truncf %5 : vector<128x16xf32> to vector<128x16xbf16>
    %c0_5 = arith.constant 0 : index
    %c0_6 = arith.constant 0 : index
    %c0_7 = arith.constant 0 : index
    %7 = vector.load %arg4[%c0_5, %c0_6, %c0_7] : memref<1x16x16xf32, #tpu.memory_space<vmem>>, vector<1x16x16xf32>
    %8 = vector.shape_cast %7 : vector<1x16x16xf32> to vector<16x16xf32>
    %9 = arith.truncf %8 : vector<16x16xf32> to vector<16x16xbf16>
    %10 = tpu.concatenate %0, %3, %6, %9, %0 in 0 : vector<1x16xbf16>, vector<16x16xbf16>, vector<128x16xbf16>, vector<16x16xbf16>, vector<1x16xbf16> -> vector<162x16xbf16>
    %c0_8 = arith.constant 0 : index
    %c0_9 = arith.constant 0 : index
    %11 = vector.load %arg5[%c0_8, %c0_9] : memref<16x4xbf16, #tpu.memory_space<vmem>>, vector<16x4xbf16>
    %cst_10 = arith.constant dense<0.000000e+00> : vector<162x4xf32>
    %12 = tpu.matmul %10, %11, %cst_10 {dimension_numbers = #tpu.dot_dimension_numbers<[1], [0], [0], [1], [0, 0, 1, 1], [], []>} : vector<162x16xbf16>, vector<16x4xbf16>, vector<162x4xf32> -> vector<162x4xf32>
    %c0_11 = arith.constant 0 : index
    %c0_12 = arith.constant 0 : index
    %13 = vector.load %arg6[%c0_11, %c0_12] : memref<1x4xf32, #tpu.memory_space<vmem>>, vector<1x4xf32>
    %14 = vector.broadcast %13 : vector<1x4xf32> to vector<162x4xf32>
    %15 = arith.addf %12, %14 : vector<162x4xf32>
    %cst_13 = arith.constant 0.000000e+00 : f32
    %16 = vector.broadcast %cst_13 : f32 to vector<162x4xf32>
    %17 = arith.maximumf %15, %16 : vector<162x4xf32>
    %18 = arith.truncf %17 : vector<162x4xf32> to vector<162x4xbf16>
    %19 = tpu.iota {dimensions = array<i32: 0>} : vector<128x1xi32>
    %c16_i32 = arith.constant 16 : i32
    %c0_i32 = arith.constant 0 : i32
    %20 = arith.cmpi eq, %c16_i32, %c0_i32 : i32
    %c1_i32 = arith.constant 1 : i32
    %21 = arith.select %20, %c1_i32, %c16_i32 : i32
    %22 = vector.broadcast %21 : i32 to vector<128x1xi32>
    %23 = arith.remsi %19, %22 : vector<128x1xi32>
    %c0_i32_14 = arith.constant 0 : i32
    %24 = vector.broadcast %c0_i32_14 : i32 to vector<128x1xi32>
    %25 = arith.cmpi ne, %23, %24 : vector<128x1xi32>
    %c0_i32_15 = arith.constant 0 : i32
    %26 = vector.broadcast %c0_i32_15 : i32 to vector<128x1xi32>
    %27 = arith.cmpi slt, %23, %26 : vector<128x1xi32>
    %c0_i32_16 = arith.constant 0 : i32
    %28 = arith.cmpi slt, %21, %c0_i32_16 : i32
    %29 = vector.broadcast %28 : i1 to vector<128x1xi1>
    %30 = vector.broadcast %29 : vector<128x1xi1> to vector<128x1xi1>
    %31 = arith.xori %27, %30 : vector<128x1xi1>
    %32 = arith.andi %31, %25 : vector<128x1xi1>
    %33 = vector.broadcast %21 : i32 to vector<128x1xi32>
    %34 = arith.addi %23, %33 : vector<128x1xi32>
    %35 = arith.select %32, %34, %23 : vector<128x1xi1>, vector<128x1xi32>
    %c0_i32_17 = arith.constant 0 : i32
    %36 = vector.broadcast %c0_i32_17 : i32 to vector<128x1xi32>
    %37 = arith.cmpi sgt, %35, %36 : vector<128x1xi32>
    %c15_i32 = arith.constant 15 : i32
    %38 = vector.broadcast %c15_i32 : i32 to vector<128x1xi32>
    %39 = arith.cmpi slt, %35, %38 : vector<128x1xi32>
    %cst_18 = arith.constant 0.000000e+00 : bf16
    %40 = vector.broadcast %cst_18 : bf16 to vector<128x4xbf16>
    %41 = vector.extract_strided_slice %18 {offsets = [0, 0], sizes = [128, 4], strides = [1, 1]} : vector<162x4xbf16> to vector<128x4xbf16>
    %42 = vector.shape_cast %37 : vector<128x1xi1> to vector<128x1xi1>
    %43 = vector.broadcast %42 : vector<128x1xi1> to vector<128x4xi1>
    %44 = arith.select %43, %41, %40 : vector<128x4xi1>, vector<128x4xbf16>
    %45 = vector.extract_strided_slice %18 {offsets = [1, 0], sizes = [128, 4], strides = [1, 1]} : vector<162x4xbf16> to vector<128x4xbf16>
    %46 = vector.extract_strided_slice %18 {offsets = [2, 0], sizes = [128, 4], strides = [1, 1]} : vector<162x4xbf16> to vector<128x4xbf16>
    %47 = vector.shape_cast %39 : vector<128x1xi1> to vector<128x1xi1>
    %48 = vector.broadcast %47 : vector<128x1xi1> to vector<128x4xi1>
    %49 = arith.select %48, %46, %40 : vector<128x4xi1>, vector<128x4xbf16>
    %50 = vector.extract_strided_slice %18 {offsets = [16, 0], sizes = [128, 4], strides = [1, 1]} : vector<162x4xbf16> to vector<128x4xbf16>
    %51 = vector.shape_cast %37 : vector<128x1xi1> to vector<128x1xi1>
    %52 = vector.broadcast %51 : vector<128x1xi1> to vector<128x4xi1>
    %53 = arith.select %52, %50, %40 : vector<128x4xi1>, vector<128x4xbf16>
    %54 = vector.extract_strided_slice %18 {offsets = [17, 0], sizes = [128, 4], strides = [1, 1]} : vector<162x4xbf16> to vector<128x4xbf16>
    %55 = vector.extract_strided_slice %18 {offsets = [18, 0], sizes = [128, 4], strides = [1, 1]} : vector<162x4xbf16> to vector<128x4xbf16>
    %56 = vector.shape_cast %39 : vector<128x1xi1> to vector<128x1xi1>
    %57 = vector.broadcast %56 : vector<128x1xi1> to vector<128x4xi1>
    %58 = arith.select %57, %55, %40 : vector<128x4xi1>, vector<128x4xbf16>
    %59 = vector.extract_strided_slice %18 {offsets = [32, 0], sizes = [128, 4], strides = [1, 1]} : vector<162x4xbf16> to vector<128x4xbf16>
    %60 = vector.shape_cast %37 : vector<128x1xi1> to vector<128x1xi1>
    %61 = vector.broadcast %60 : vector<128x1xi1> to vector<128x4xi1>
    %62 = arith.select %61, %59, %40 : vector<128x4xi1>, vector<128x4xbf16>
    %63 = vector.extract_strided_slice %18 {offsets = [33, 0], sizes = [128, 4], strides = [1, 1]} : vector<162x4xbf16> to vector<128x4xbf16>
    %64 = vector.extract_strided_slice %18 {offsets = [34, 0], sizes = [128, 4], strides = [1, 1]} : vector<162x4xbf16> to vector<128x4xbf16>
    %65 = vector.shape_cast %39 : vector<128x1xi1> to vector<128x1xi1>
    %66 = vector.broadcast %65 : vector<128x1xi1> to vector<128x4xi1>
    %67 = arith.select %66, %64, %40 : vector<128x4xi1>, vector<128x4xbf16>
    %68 = tpu.concatenate %44, %45, %49, %53, %54, %58, %62, %63, %67 in 1 : vector<128x4xbf16>, vector<128x4xbf16>, vector<128x4xbf16>, vector<128x4xbf16>, vector<128x4xbf16>, vector<128x4xbf16>, vector<128x4xbf16>, vector<128x4xbf16>, vector<128x4xbf16> -> vector<128x36xbf16>
    %c0_19 = arith.constant 0 : index
    %c0_20 = arith.constant 0 : index
    %69 = vector.load %arg7[%c0_19, %c0_20] : memref<36x4xbf16, #tpu.memory_space<vmem>>, vector<36x4xbf16>
    %cst_21 = arith.constant dense<0.000000e+00> : vector<128x4xf32>
    %70 = tpu.matmul %68, %69, %cst_21 {dimension_numbers = #tpu.dot_dimension_numbers<[1], [0], [0], [1], [0, 0, 1, 1], [], []>} : vector<128x36xbf16>, vector<36x4xbf16>, vector<128x4xf32> -> vector<128x4xf32>
    %c0_22 = arith.constant 0 : index
    %c0_23 = arith.constant 0 : index
    %71 = vector.load %arg8[%c0_22, %c0_23] : memref<1x4xf32, #tpu.memory_space<vmem>>, vector<1x4xf32>
    %72 = vector.broadcast %71 : vector<1x4xf32> to vector<128x4xf32>
    %73 = arith.addf %70, %72 : vector<128x4xf32>
    %cst_24 = arith.constant 0.000000e+00 : f32
    %74 = vector.broadcast %cst_24 : f32 to vector<128x4xf32>
    %75 = arith.maximumf %73, %74 : vector<128x4xf32>
    %76 = arith.truncf %75 : vector<128x4xf32> to vector<128x4xbf16>
    %c0_25 = arith.constant 0 : index
    %c0_26 = arith.constant 0 : index
    %77 = vector.load %arg9[%c0_25, %c0_26] : memref<4x16xbf16, #tpu.memory_space<vmem>>, vector<4x16xbf16>
    %cst_27 = arith.constant dense<0.000000e+00> : vector<128x16xf32>
    %78 = tpu.matmul %76, %77, %cst_27 {dimension_numbers = #tpu.dot_dimension_numbers<[1], [0], [0], [1], [0, 0, 1, 1], [], []>} : vector<128x4xbf16>, vector<4x16xbf16>, vector<128x16xf32> -> vector<128x16xf32>
    %c0_28 = arith.constant 0 : index
    %c0_29 = arith.constant 0 : index
    %79 = vector.load %arg10[%c0_28, %c0_29] : memref<1x16xf32, #tpu.memory_space<vmem>>, vector<1x16xf32>
    %80 = vector.broadcast %79 : vector<1x16xf32> to vector<128x16xf32>
    %81 = arith.addf %78, %80 : vector<128x16xf32>
    %c0_30 = arith.constant 0 : index
    %c0_31 = arith.constant 0 : index
    %c0_32 = arith.constant 0 : index
    %82 = vector.load %arg2[%c0_30, %c0_31, %c0_32] : memref<1x128x16xf32, #tpu.memory_space<vmem>>, vector<1x128x16xf32>
    %83 = vector.shape_cast %82 : vector<1x128x16xf32> to vector<128x16xf32>
    %84 = arith.addf %81, %83 : vector<128x16xf32>
    %cst_33 = arith.constant 0.000000e+00 : f32
    %85 = vector.broadcast %cst_33 : f32 to vector<128x16xf32>
    %86 = arith.maximumf %84, %85 : vector<128x16xf32>
    %c0_34 = arith.constant 0 : index
    %c0_35 = arith.constant 0 : index
    %c0_36 = arith.constant 0 : index
    %87 = vector.load %arg11[%c0_34, %c0_35, %c0_36] : memref<1x128x16xf32, #tpu.memory_space<vmem>>, vector<1x128x16xf32>
    %88 = vector.shape_cast %87 : vector<1x128x16xf32> to vector<128x16xf32>
    %89 = vector.shape_cast %86 : vector<128x16xf32> to vector<1x128x16xf32>
    tpu.vector_store %arg11[%c0_34, %c0_35, %c0_36], %89 {strides = array<i32>} : memref<1x128x16xf32, #tpu.memory_space<vmem>>, vector<1x128x16xf32>,
    return
  }
  func.func @transform_0(%arg0: i32, %arg1: i32) -> (i32, i32, i32) {
    %c0_i32 = arith.constant 0 : i32
    %c0_i32_0 = arith.constant 0 : i32
    return %arg0, %arg1, %c0_i32 : i32, i32, i32
  }
  func.func @transform_1(%arg0: i32, %arg1: i32) -> (i32, i32, i32) {
    %c0_i32 = arith.constant 0 : i32
    %c0_i32_0 = arith.constant 0 : i32
    return %arg0, %arg1, %c0_i32 : i32, i32, i32
  }
  func.func @transform_2(%arg0: i32, %arg1: i32) -> (i32, i32, i32) {
    %c0_i32 = arith.constant 0 : i32
    %c0_i32_0 = arith.constant 0 : i32
    return %arg0, %arg1, %c0_i32 : i32, i32, i32
  }
  func.func @transform_3(%arg0: i32, %arg1: i32) -> (i32, i32) {
    %c0_i32 = arith.constant 0 : i32
    %c0_i32_0 = arith.constant 0 : i32
    %c0_i32_1 = arith.constant 0 : i32
    return %c0_i32, %c0_i32_0 : i32, i32
  }
  func.func @transform_4(%arg0: i32, %arg1: i32) -> (i32, i32) {
    %c0_i32 = arith.constant 0 : i32
    %c0_i32_0 = arith.constant 0 : i32
    %c0_i32_1 = arith.constant 0 : i32
    return %c0_i32, %c0_i32_0 : i32, i32
  }
  func.func @transform_5(%arg0: i32, %arg1: i32) -> (i32, i32) {
    %c0_i32 = arith.constant 0 : i32
    %c0_i32_0 = arith.constant 0 : i32
    %c0_i32_1 = arith.constant 0 : i32
    return %c0_i32, %c0_i32_0 : i32, i32
  }
  func.func @transform_6(%arg0: i32, %arg1: i32) -> (i32, i32) {
    %c0_i32 = arith.constant 0 : i32
    %c0_i32_0 = arith.constant 0 : i32
    %c0_i32_1 = arith.constant 0 : i32
    return %c0_i32, %c0_i32_0 : i32, i32
  }
  func.func @transform_7(%arg0: i32, %arg1: i32) -> (i32, i32) {
    %c0_i32 = arith.constant 0 : i32
    %c0_i32_0 = arith.constant 0 : i32
    %c0_i32_1 = arith.constant 0 : i32
    return %c0_i32, %c0_i32_0 : i32, i32
  }
  func.func @transform_8(%arg0: i32, %arg1: i32) -> (i32, i32) {
    %c0_i32 = arith.constant 0 : i32
    %c0_i32_0 = arith.constant 0 : i32
    %c0_i32_1 = arith.constant 0 : i32
    return %c0_i32, %c0_i32_0 : i32, i32
  }
  func.func @transform_9(%arg0: i32, %arg1: i32) -> (i32, i32, i32) {
    %c0_i32 = arith.constant 0 : i32
    %c0_i32_0 = arith.constant 0 : i32
    return %arg0, %arg1, %c0_i32 : i32, i32, i32
  }
}

</mosaic_0001>

<bundles_post_ra>
// kernel: tpu_custom_call.1
= control target key start
LH: loop header
LB: loop body
LE: loop exit
PB: predicated region body
PF: predicated region fallthrough
CT: control target
= control target key end

     0   :  { %s2559_s30 = smov 0   ;;  %s2561_s10 = smov 0   ;;  %s3549_s0 = inlined_call_operand.vmem [shape: f32[2,256,16], index: 0, kind: input, shape index: {}]   ;;  %s3550_s1 = inlined_call_operand.vmem [shape: f32[2,32,16], index: 1, kind: input, shape index: {}]   ;;  %s3551_s2 = inlined_call_operand.vmem [shape: f32[2,32,16], index: 2, kind: input, shape index: {}]   ;;  %s3552_s3 = inlined_call_operand.vmem [shape: bf16[16,4], index: 3, kind: input, shape index: {}]   ;;  %s3553_s4 = inlined_call_operand.vmem [shape: f32[1,4], index: 4, kind: input, shape index: {}]   ;;  %s3554_s5 = inlined_call_operand.vmem [shape: bf16[36,4], index: 5, kind: input, shape index: {}]   ;;  %s3555_s6 = inlined_call_operand.vmem [shape: f32[1,4], index: 6, kind: input, shape index: {}]   ;;  %s3556_s7 = inlined_call_operand.vmem [shape: bf16[4,16], index: 7, kind: input, shape index: {}]   ;;  %s3557_s8 = inlined_call_operand.vmem [shape: f32[1,16], index: 8, kind: input, shape index: {}]   ;;  %s3558_s9 = inlined_call_operand.vmem [shape: f32[2,256,16], index: 9, kind: output, shape index: {}]  }
   0x1   :  { %s2563_s11 = smov 0   ;;  %s2565_s12 = smov 0  }
   0x2   :  { %s2567_s13 = smov 0  }
   0x3 LB: > { %s28_s14 = sadd.s32 1, %s2487_s11  ;;  %s31_s15 = sadd.s32 1, %s2491_s12  ;;  %s2495_s13 = sphi %s2567_s13, %s19_s13   ;;  %s2491_s12 = sphi %s2565_s12, %s3639_s12   ;;  %s2487_s11 = sphi %s2563_s11, %s3638_s11   ;;  %s2483_s10 = sphi %s2561_s10, %s3637_s10   ;;  %s2479_s30 = sphi %s2559_s30, %s3636_s30  }
   0x4   : > { %p29_p0 = scmp.ge.s32.totalorder %s28_s14, 2  ;;  %p2198_p1 = scmp.ge.s32.totalorder %s2495_s13, 1 }
   0x5   : > { %p342_p2 = scmp.lt.s32.totalorder %s2495_s13, 5 }
   0x6   : > { %s3641_s14 = smov (%p29_p0, %s28_s14), 0  ;;  %s3643_s15 = smov (!%p29_p0, %s31_s15), %s2491_s12 }
   0x7   : > { %p343_p3 = pnand %p2198_p1, %p342_p2  ;;  %p33_p4 = scmp.ge.s32.totalorder %s3643_s15, 2 }
   0x8   : > { %s2199_s18 = sshll.u32 (!%p343_p3), %s2479_s30, 4  ;;  %p405_p5 = scmp.lt.s32.totalorder (!%p343_p3), %s2483_s10, 1 }
   0x9   : > { %s3645_s15 = smov (%p33_p4, %s3643_s15), 0  ;;  %346 = sbr.rel (%p343_p3) target bundleno = 898 (0x382), region = 56 }
   0xa   : > { %p407_p6 = scmp.lt.s32.totalorder (!%p343_p3), %s2199_s18, 31  ;;  %s2202_s19 = sshll.u32 (!%p343_p3), %s2479_s30, 1 }
   0xb   : > { %p417_p7 = scmp.lt.s32.totalorder (!%p343_p3), %s2202_s19, 3  ;;  %s2501_s23 = smov (!%p343_p3), 12  }
   0xc   : > { %s2502_s24 = smov (!%p343_p3), 8   ;;  %s2508_s29 = smov (!%p343_p3), 28  }
   0xe   : > { %v2437_v0 = vld [vmem:[%s3552_s3] sm:$0xff]   ;;  %v2497_v1 = vmov 0.0   ;;  %vm2498_vm0 = vmmov 0   ;;  %s3647_s10 = smov (!%p405_p5, %s2483_s10), 1  ;;  %s3649_s18 = smov (!%p407_p6, %s2199_s18), 31  ;;  %vm3561_vm2 = vcmask 1040384  }
   0xf   : > { %2295 = vmatprep.subr.bf16.mxu0 %v2497_v1  ;;  %2381 = vmatprep.subr.bf16.mxu1 %v2497_v1  ;;  %s2200_s20 = sshll.u32 %s3647_s10, 5  ;;  %s2203_s26 = sshll.u32 %s3647_s10, 2  ;;  %vm486_vm1 = vsmask.f32 256  ;;  %vm3560_vm4 = vcmask 130048   ;;  %vm2499_vm7 = vmmov 1  }
  0x10   : > { %2296 = vmatpush3.bf16.msra.mxu0 %v2437_v0  ;;  %2297 = vmatprep.mubr.msk.bf16.mxu0 %vm2498_vm0, %v2497_v1  ;;  %s2602_s21 = sadd.s32 %s2200_s20, %s3649_s18  ;;  %s3651_s19 = smov (!%p417_p7, %s2202_s19), 3  ;;  %vm2626_vm3 = vmand %vm3561_vm2, %vm486_vm1 }
  0x11   : > { %2382 = vmatpush3.bf16.msra.mxu1 %v2437_v0  ;;  %2337 = vmatprep.mubr.msk.bf16.mxu1 %vm2498_vm0, %v2497_v1  ;;  %s2201_s22 = sshll.u32 %s2602_s21, 3  ;;  %s420_s27 = sadd.s32 %s2203_s26, %s3651_s19  ;;  %vm1042_vm8 = vmpackc.low %vm2499_vm7, %vm2499_vm7 }
  0x12   : > { %s2610_s25 = scalar_lea.vmem %s3549_s0, %s2201_s22  ;;  %s2204_s28 = sshll.u32 %s420_s27, 3 }
  0x13   : > { %v450_v2 = vld [vmem:[%s2610_s25] sm:$0xff]  ;;  %v451_v3 = vld [vmem:[%s2610_s25 + $0x8] sm:$0xff]  ;;  %s422_s16 = scalar_lea.vmem %s3550_s1, %s2204_s28  ;;  %s432_s18 = scalar_lea.vmem %s3551_s2, %s2204_s28  ;;  %v452_v11 = vld [vmem:[%s2610_s25 + $0x10] sm:$0xff] }
  0x14   : > { %v466_v4 = vpack.c.bf16 %v451_v3, %v450_v2  ;;  %v447_v5 = vld [vmem:[%s422_s16] sm:$0xff]  ;;  %v448_v6 = vld [vmem:[%s422_s16 + $0x8] sm:$0xff]  ;;  %v453_v12 = vld [vmem:[%s2610_s25 + $0x18] sm:$0xff]  ;;  %s2503_s26 = smov 4   ;;  %s2504_s27 = smov 24  }
  0x15   : > { %v449_v7 = vpack.c.bf16 %v448_v6, %v447_v5  ;;  %v464_v13 = vld [vmem:[%s2610_s25 + $0x70] sm:$0xff]  ;;  %v465_v14 = vld [vmem:[%s2610_s25 + $0x78] sm:$0xff]  ;;  %v467_v17 = vpack.c.bf16 %v453_v12, %v452_v11  ;;  %v474_v18 = vld [vmem:[%s432_s18] sm:$0xff]  ;;  %s2505_s28 = smov 20   ;;  %s2506_s16 = smov 16  }
  0x16   : > { %v488_v10 = vshrl.u32 %v466_v4, 16  ;;  %v475_v19 = vld [vmem:[%s432_s18 + $0x8] sm:$0xff]  ;;  %v491_v22 = vshll.u32 %v466_v4, 16  ;;  %v2630_v23 = vpack.c.bf16 %v465_v14, %v464_v13  ;;  %v454_v28 = vld [vmem:[%s2610_s25 + $0x20] sm:$0xff]  ;;  %v456_v44 = vld [vmem:[%s2610_s25 + $0x30] sm:$0xff]  ;;  %s2507_s20 = smov 32   ;;  %s3471_s10 = scalar_lea.vmem %s3558_s9, %s2201_s22 }
  0x17   : > { %v478_v8 = vshrl.u32 %v449_v7, 16  ;;  %v481_v9 = vshll.u32 %v449_v7, 16  ;;  %v476_v25 = vpack.c.bf16 %v475_v19, %v474_v18  ;;  %v495_v26 = vshrl.u32 %v467_v17, 16  ;;  %v455_v29 = vld [vmem:[%s2610_s25 + $0x28] sm:$0xff]  ;;  %v457_v45 = vld [vmem:[%s2610_s25 + $0x38] sm:$0xff]  ;;  %v458_v52 = vld [vmem:[%s2610_s25 + $0x40] sm:$0xff] }
  0x18   : > { %v490_v21 = vrot.slane %v488_v10, 7  ;;  %v543_v30 = vshrl.u32 %v2630_v23, 16  ;;  %v498_v35 = vshll.u32 %v467_v17, 16  ;;  %v468_v36 = vpack.c.bf16 %v455_v29, %v454_v28  ;;  %v459_v53 = vld [vmem:[%s2610_s25 + $0x48] sm:$0xff]  ;;  %v460_v60 = vld [vmem:[%s2610_s25 + $0x50] sm:$0xff]  ;;  %v461_v61 = vld [vmem:[%s2610_s25 + $0x58] sm:$0xff] }
  0x19   : > { %v480_v15 = vrot.slane %v478_v8, 7  ;;  %v553_v31 = vshrl.u32 %v476_v25, 16  ;;  %v556_v32 = vshll.u32 %v476_v25, 16  ;;  %v497_v34 = vrot.slane %v495_v26, 7  ;;  %v462_v5 = vld [vmem:[%s2610_s25 + $0x60] sm:$0xff]  ;;  %v463_v6 = vld [vmem:[%s2610_s25 + $0x68] sm:$0xff] }
  0x1a   : > { %v493_v27 = vor.u32 %v491_v22, %v490_v21  ;;  %v2642_v38 = vrot.slane %v543_v30, 7  ;;  %v503_v43 = vshrl.u32 %v468_v36, 16  ;;  %v506_v48 = vshll.u32 %v468_v36, 16 }
  0x1b   : > { %v483_v20 = vor.u32 %v481_v9, %v480_v15  ;;  %v555_v33 = vrot.slane %v553_v31, 7  ;;  %v500_v42 = vor.u32 %v498_v35, %v497_v34  ;;  %v469_v49 = vpack.c.bf16 %v457_v45, %v456_v44 }
  0x1c   : > { %v564_v37 = vsel %vm2626_vm3, %v480_v15, %v493_v27  ;;  %v505_v47 = vrot.slane %v503_v43, 7  ;;  %v470_v57 = vpack.c.bf16 %v459_v53, %v458_v52  ;;  %v471_v2 = vpack.c.bf16 %v461_v61, %v460_v60 }
  0x1d   : > { %v563_v24 = vsel %vm2626_vm3, 0, %v483_v20  ;;  %v2644_v39 = vor.u32 %v556_v32, %v555_v33  ;;  %v566_v40 = vsel %vm2626_vm3, %v555_v33, 0  ;;  %v501_v46 = vsel %vm486_vm1, %v490_v21, %v500_v42  ;;  %v2709_v32 = vld [vmem:[%s3553_s4] ss:$0 sm:$0xff] }
  0x1e   : > { %2298 = vmatmul.mubr.msk.bf16.vlgmr.msra.gmra.mxu0 %vm3560_vm4, %v563_v24  ;;  %2338 = vmatmul.mubr.msk.bf16.vlgmr.msra.gmra.mxu1 %vm3560_vm4, %v566_v40  ;;  %v508_v50 = vor.u32 %v506_v48, %v505_v47  ;;  %v511_v51 = vshrl.u32 %v469_v49, 16  ;;  %v514_v56 = vshll.u32 %v469_v49, 16  ;;  %v519_v59 = vshrl.u32 %v470_v57, 16 }
  0x1f   : > { %2301 = vmatprep.mubr.msk.bf16.mxu0 %vm2498_vm0, %v2497_v1  ;;  %v565_v41 = vsel %vm2626_vm3, %v2642_v38, %v2644_v39  ;;  %v522_v0 = vshll.u32 %v470_v57, 16  ;;  %v527_v4 = vshrl.u32 %v471_v2, 16  ;;  %v530_v9 = vshll.u32 %v471_v2, 16 }
  0x20   : > { %v509_v54 = vsel %vm486_vm1, %v497_v34, %v508_v50  ;;  %v513_v55 = vrot.slane %v511_v51, 7  ;;  %v521_v63 = vrot.slane %v519_v59, 7  ;;  %v472_v10 = vpack.c.bf16 %v463_v6, %v462_v5 }
  0x21   : > { %v529_v8 = vrot.slane %v527_v4, 7  ;;  %v546_v18 = vshll.u32 %v2630_v23, 16  ;;  %v768_v21 = vlaneseq  ;;  %v2500_v34 = vmov 0  }
  0x22   : > { %v516_v58 = vor.u32 %v514_v56, %v513_v55  ;;  %v524_v3 = vor.u32 %v522_v0, %v521_v63  ;;  %v535_v12 = vshrl.u32 %v472_v10, 16  ;;  %v538_v15 = vshll.u32 %v472_v10, 16 }
  0x23   : > { %v532_v11 = vor.u32 %v530_v9, %v529_v8  ;;  %v548_v19 = vor.u32 %v546_v18, %v2642_v38  ;;  %v2695_v22 = vshrl.u32 %v768_v21, 7  ;;  %v2722_v40 = vsel %vm1042_vm8, 65537, %v2500_v34 }
  0x24   : > { %v517_v62 = vsel %vm486_vm1, %v505_v47, %v516_v58  ;;  %v525_v7 = vsel %vm486_vm1, %v513_v55, %v524_v3  ;;  %v537_v14 = vrot.slane %v535_v12, 7 }
  0x25   : > { %v533_v13 = vsel %vm486_vm1, %v521_v63, %v532_v11  ;;  %v772_v23 = vadd.s32 24, %v2695_v22  ;;  %v770_v24 = vadd.s32 8, %v2695_v22  ;;  %v789_v26 = vand.u32 15, %v2695_v22 }
  0x26   : > { %2302 = vmatmul.mubr.msk.bf16.gmra.mxu0 %vm3560_vm4, %v564_v37  ;;  %v540_v16 = vor.u32 %v538_v15, %v537_v14  ;;  %v549_v20 = vsel %vm486_vm1, %v537_v14, %v548_v19  ;;  %v771_v28 = vadd.s32 16, %v2695_v22  ;;  %v774_v29 = vadd.s32 40, %v2695_v22 }
  0x27   : > { %2305 = vmatprep.mubr.msk.bf16.mxu0 %vm2498_vm0, %v2497_v1  ;;  %v810_v25 = vand.u32 15, %v772_v23  ;;  %v796_v27 = vand.u32 15, %v770_v24  ;;  %vm977_vm6 = vcmp.gt.s32.totalorder %v789_v26, 0  ;;  %v773_v45 = vadd.s32 32, %v2695_v22 }
  0x28   : > { %v541_v17 = vsel %vm486_vm1, %v529_v8, %v540_v16  ;;  %v803_v30 = vand.u32 15, %v771_v28  ;;  %vm1041_vm11 = vmpackc.low %vm977_vm6, %vm977_vm6  ;;  %v824_v31 = vand.u32 15, %v774_v29  ;;  %v776_v61 = vadd.s32 56, %v2695_v22 }
  0x29   : > { %vm996_vm5 = vcmp.lt.s32.totalorder %v810_v25, 15  ;;  %vm2702_vm9 = vcmp.lt.s32.totalorder %v796_v27, 15  ;;  %v1057_v37 = vsel %vm1041_vm11, 65537, %v2500_v34  ;;  %v817_v56 = vand.u32 15, %v773_v45 }
  0x2a   : > { %vm1148_vm10 = vmpackc.low %vm996_vm5, %vm996_vm5  ;;  %vm2716_vm13 = vcmp.gt.s32.totalorder %v803_v30, 0  ;;  %vm2725_vm14 = vcmp.lt.s32.totalorder %v824_v31, 15  ;;  %v2224_v47 = vcombine.low %v1057_v37, %v2722_v40  ;;  %v775_v0 = vadd.s32 48, %v2695_v22 }
  0x2b   : > { %vm1146_vm12 = vmpackc.low %vm2702_vm9, %vm2702_vm9  ;;  %v1164_v35 = vsel %vm1148_vm10, 65537, %v2500_v34  ;;  %vm2764_vm3 = vcmp.gt.s32.totalorder %v817_v56, 0  ;;  %vm1362_vm9 = vcmask 1046528   ;;  %vm1268_vm10 = vsmask.f32 7424 }
  0x2c   : > { %v2233_v44 = vcombine.low %v2722_v40, %v1164_v35  ;;  %vm1043_vm15 = vmpackc.low %vm2716_vm13, %vm2716_vm13  ;;  %vm2747_vm1 = vcmp.ne.s16.totalorder %v2224_v47, 0  ;;  %v831_v15 = vand.u32 15, %v775_v0  ;;  %v778_v21 = vadd.s32 72, %v2695_v22 }
  0x2d   : > { %v1059_v55 = vsel %vm1043_vm15, 65537, %v2500_v34  ;;  %vm1045_vm8 = vmpackc.low %vm2764_vm3, %vm2764_vm3  ;;  %v777_v30 = vadd.s32 64, %v2695_v22 }
  0x2e   : > { %2306 = vmatmul.mubr.msk.bf16.gmra.mxu0 %vm3560_vm4, %v501_v46  ;;  %v2225_v4 = vcombine.low %v1059_v55, %v2722_v40  ;;  %v1061_v29 = vsel %vm1045_vm8, 65537, %v2500_v34 }
  0x2f   : > { %2309 = vmatprep.mubr.msk.bf16.mxu0 %vm2498_vm0, %v2497_v1 }
  0x30   : > { %vm2775_vm7 = vcmp.ne.s16.totalorder %v2225_v4, 0 }
  0x36   : > { %2310 = vmatmul.mubr.msk.bf16.gmra.mxu0 %vm3560_vm4, %v509_v54  ;;  %v2742_v54 = vrot.slane %v2233_v44, 7 }
  0x37   : > { %2313 = vmatprep.mubr.msk.bf16.mxu0 %vm2498_vm0, %v2497_v1 }
  0x3e   : > { %2314 = vmatmul.mubr.msk.bf16.gmra.mxu0 %vm3560_vm4, %v517_v62 }
  0x3f   : > { %2317 = vmatprep.mubr.msk.bf16.mxu0 %vm2498_vm0, %v2497_v1 }
  0x46   : > { %2318 = vmatmul.mubr.msk.bf16.gmra.mxu0 %vm3560_vm4, %v525_v7 }
  0x47   : > { %2321 = vmatprep.mubr.msk.bf16.mxu0 %vm2498_vm0, %v2497_v1 }
  0x4e   : > { %2322 = vmatmul.mubr.msk.bf16.gmra.mxu0 %vm3560_vm4, %v533_v13  ;;  %v838_v13 = vand.u32 15, %v776_v61 }
  0x4f   : > { %2325 = vmatprep.mubr.msk.bf16.mxu0 %vm2498_vm0, %v2497_v1 }
  0x50   : > { %vm2790_vm11 = vcmp.lt.s32.totalorder %v838_v13, 15 }
  0x51   : > { %vm1152_vm13 = vmpackc.low %vm2790_vm11, %vm2790_vm11 }
  0x52   : > { %v1168_v56 = vsel %vm1152_vm13, 65537, %v2500_v34 }
  0x56   : > { %2326 = vmatmul.mubr.msk.bf16.gmra.mxu0 %vm3560_vm4, %v541_v17 }
  0x57   : > { %2329 = vmatprep.mubr.msk.bf16.mxu0 %vm2498_vm0, %v2497_v1 }
  0x5e   : > { %2330 = vmatmul.mubr.msk.bf16.gmra.mxu0 %vm3560_vm4, %v549_v20 }
  0x5f   : > { %2333 = vmatprep.mubr.msk.bf16.mxu0 %vm2498_vm0, %v2497_v1  ;;  %vm1150_vm0 = vmpackc.low %vm2725_vm14, %vm2725_vm14 }
  0x60   : > { %v1166_v60 = vsel %vm1150_vm0, 65537, %v2500_v34 }
  0x61   : > { %v2234_v7 = vcombine.low %v2722_v40, %v1166_v60 }
  0x63   : > { %v2782_v20 = vrot.slane %v2234_v7, 7 }
  0x66   : > { %2334 = vmatmul.mubr.msk.bf16.gmra.mxu0 %vm3560_vm4, %v565_v41  ;;  %v1162_v41 = vsel %vm1146_vm12, 65537, %v2500_v34  ;;  %vm2796_vm12 = vcmp.gt.s32.totalorder %v831_v15, 0 }
  0x67   : > { %v2232_v49 = vcombine.low %v2722_v40, %v1162_v41  ;;  %v852_v41 = vand.u32 15, %v778_v21  ;;  %vm1047_vm14 = vmpackc.low %vm2796_vm12, %vm2796_vm12 }
  0x69   : > { %v2753_v63 = vrot.slane %v2232_v49, 7  ;;  %v2226_v49 = vcombine.low %v1061_v29, %v2722_v40  ;;  %vm2839_vm15 = vcmp.lt.s32.totalorder %v852_v41, 15 }
  0x6a   : > { %vm1154_vm11 = vmpackc.low %vm2839_vm15, %vm2839_vm15 }
  0x6b   : > { %v2761_v6 = vsel %vm3561_vm2, %v2753_v63, %v2742_v54  ;;  %vm1216_vm5 = vcmp.ne.s16.totalorder %v2753_v63, 0  ;;  %vm2849_vm3 = vcmp.ne.s16.totalorder %v2226_v49, 0 }
  0x6c   : > { %vm1217_vm6 = vcmp.ne.s16.totalorder %v2761_v6, 0 }
  0xde   : > { %v650_v33 = vpop.f32.mrf.mxu0  ;;  %v2740_v50 = vpop.f32.mrf.mxu1 }
  0xdf   : > { %v651_v39 = vadd.f32 %v2709_v32, %v650_v33 }
  0xe0   : > { %v2299_v36 = vpop.f32.mrf.mxu0  ;;  %v2339_v57 = vpop.f32.mrf.mxu1 }
  0xe1   : > { %v736_v51 = vmax.f32 %v651_v39, 0.0 }
  0xe2   : > { %v653_v43 = vpop.f32.mrf.mxu0  ;;  %v733_v2 = vpop.f32.mrf.mxu1 }
  0xe3   : > { %v654_v46 = vadd.f32 %v2709_v32, %v653_v43  ;;  %v2235_v2 = vcombine.low %v2722_v40, %v1168_v56 }
  0xe4   : > { %v2300_v48 = vpop.f32.mrf.mxu0  ;;  %v2340_v9 = vpop.f32.mrf.mxu1 }
  0xe5   : > { %v737_v52 = vmax.f32 %v654_v46, 0.0  ;;  %v2824_v48 = vsel %vm3561_vm2, %v2742_v54, %v2782_v20 }
  0xe6   : > { %v658_v53 = vpop.f32.mrf.mxu0  ;;  %vm1218_vm0 = vcmp.ne.s16.totalorder %v2824_v48, 0 }
  0xe7   : > { %v2745_v58 = vpack.c.bf16 %v737_v52, %v736_v51  ;;  %v659_v3 = vadd.f32 %v2709_v32, %v658_v53  ;;  %v845_v51 = vand.u32 15, %v777_v30 }
  0xe8   : > { %v2303_v62 = vpop.f32.mrf.mxu0 }
  0xe9   : > { %v1105_v10 = vsel %vm2747_vm1, %v2745_v58, 0  ;;  %v1272_v12 = vshll.u32 %v2745_v58, 16  ;;  %v738_v16 = vmax.f32 %v659_v3, 0.0  ;;  %v1225_v24 = vsel %vm1216_vm5, %v2745_v58, 0 }
  0xea   : > { %v661_v5 = vpop.f32.mrf.mxu0  ;;  %v1270_v28 = vshrl.u32 %v2745_v58, 16  ;;  %v1363_v38 = vrot.slane %v1225_v24, 1  ;;  %v1063_v3 = vsel %vm1047_vm14, 65537, %v2500_v34  ;;  %vm2855_vm8 = vcmp.gt.s32.totalorder %v845_v51, 0 }
  0xeb   : > { %v662_v11 = vadd.f32 %v2709_v32, %v661_v5  ;;  %v1274_v25 = vrot.slane %v1272_v12, 1  ;;  %vm1049_vm12 = vmpackc.low %vm2855_vm8, %vm2855_vm8  ;;  %vm3559_vm8 = vcmask 1041408  }
  0xec   : > { %v2304_v14 = vpop.f32.mrf.mxu0 }
  0xed   : > { %v739_v17 = vmax.f32 %v662_v11, 0.0  ;;  %v1275_v44 = vor.u32 %v1274_v25, %v1270_v28  ;;  %v1170_v28 = vsel %vm1154_vm11, 65537, %v2500_v34 }
  0xee   : > { %v666_v19 = vpop.f32.mrf.mxu0 }
  0xef   : > { %v2785_v23 = vpack.c.bf16 %v739_v17, %v738_v16  ;;  %v667_v31 = vadd.f32 %v2709_v32, %v666_v19  ;;  %v779_v19 = vadd.s32 80, %v2695_v22 }
  0xf0   : > { %v2307_v27 = vpop.f32.mrf.mxu0 }
  0xf1   : > { %v1234_v33 = vsel %vm2747_vm1, %v2785_v23, 0  ;;  %v2808_v35 = vsel %vm1217_vm6, %v2785_v23, 0  ;;  %v1277_v36 = vshll.u32 %v2785_v23, 16  ;;  %v1106_v42 = vsel %vm2775_vm7, %v2785_v23, 0 }
  0xf2   : > { %1404 = vrot.lane.b32.xlu0 %v1234_v33, %s2501_s23  ;;  %v669_v37 = vpop.f32.mrf.mxu0  ;;  %v1364_v39 = vrot.slane %v2808_v35, 1  ;;  %v740_v52 = vmax.f32 %v667_v31, 0.0  ;;  %v1242_v61 = vsel %vm1216_vm5, %v2785_v23, 0  ;;  %v1281_v26 = vshrl.u32 %v2785_v23, 16 }
  0xf3   : > { %v670_v43 = vadd.f32 %v2709_v32, %v669_v37  ;;  %v1279_v45 = vrot.slane %v1277_v36, 1  ;;  %v1453_v12 = vrot.slane %v1242_v61, 1  ;;  %v2227_v27 = vcombine.low %v1063_v3, %v2722_v40 }
  0xf4   : > { %v2308_v46 = vpop.f32.mrf.mxu0  ;;  %v1365_v47 = vsel %vm1362_vm9, %v1363_v38, %v1364_v39  ;;  %v1206_v37 = vrot.slane %v2235_v2, 7  ;;  %v859_v38 = vand.u32 15, %v779_v19 }
  0xf5   : > { %v741_v53 = vmax.f32 %v670_v43, 0.0  ;;  %1380 = vrot.lane.b32.xlu1 %v1365_v47, %s2502_s24  ;;  %v1280_v55 = vsel %vm1268_vm10, %v1275_v44, %v1279_v45  ;;  %v1283_v36 = vor.u32 %v1281_v26, %v1279_v45  ;;  %vm2905_vm13 = vcmp.ne.s16.totalorder %v2227_v27, 0 }
  0xf6   : > { %1337 = vrot.lane.b32.xlu0 %v1280_v55, %s2503_s26  ;;  %v674_v54 = vpop.f32.mrf.mxu0  ;;  %v1065_v44 = vsel %vm1049_vm12, 65537, %v2500_v34  ;;  %v781_v46 = vadd.s32 96, %v2695_v22  ;;  %vm2931_vm14 = vcmp.gt.s32.totalorder %v859_v38, 0  ;;  %v780_v26 = vadd.s32 88, %v2695_v22 }
  0xf7   : > { %v2843_v60 = vpack.c.bf16 %v741_v53, %v740_v52  ;;  %v675_v5 = vadd.f32 %v2709_v32, %v674_v54  ;;  %v2929_v54 = vsel %vm3561_vm2, %v2782_v20, %v1206_v37  ;;  %v2228_v3 = vcombine.low %v1065_v44, %v2722_v40  ;;  %vm1051_vm15 = vmpackc.low %vm2931_vm14, %vm2931_vm14 }
  0xf8   : > { %v2311_v62 = vpop.f32.mrf.mxu0  ;;  %vm1219_vm11 = vcmp.ne.s16.totalorder %v2929_v54, 0 }
  0xf9   : > { %v1251_v7 = vsel %vm2747_vm1, %v2843_v60, 0  ;;  %v1235_v8 = vsel %vm2775_vm7, %v2843_v60, 0  ;;  %v1243_v9 = vsel %vm1217_vm6, %v2843_v60, 0  ;;  %v2877_v14 = vsel %vm1218_vm0, %v2843_v60, 0 }
  0xfa   : > { %1494 = vrot.lane.b32.xlu0 %v1251_v7, %s2504_s27  ;;  %1406 = vrot.lane.b32.xlu1 %v1235_v8, %s2501_s23  ;;  %v677_v11 = vpop.f32.mrf.mxu0  ;;  %v1454_v13 = vrot.slane %v1243_v9, 1  ;;  %v1285_v15 = vshll.u32 %v2843_v60, 16  ;;  %v1366_v17 = vrot.slane %v2877_v14, 1  ;;  %v1107_v21 = vsel %vm2849_vm3, %v2843_v60, 0 }
  0xfb   : > { %v678_v16 = vadd.f32 %v2709_v32, %v677_v11  ;;  %v742_v29 = vmax.f32 %v675_v5, 0.0  ;;  %v1289_v20 = vshrl.u32 %v2843_v60, 16  ;;  %v873_v7 = vand.u32 15, %v781_v46  ;;  %v2438_v8 = vld [vmem:[%s3554_s5 + $0x10] ss:$0 sps:$4 sm:$0x33]  }
  0xfc   : > { %v2312_v24 = vpop.f32.mrf.mxu0  ;;  %v1455_v25 = vsel %vm1362_vm9, %v1453_v12, %v1454_v13  ;;  %v1367_v30 = vsel %vm1362_vm9, %v1364_v39, %v1366_v17  ;;  %v1287_v31 = vrot.slane %v1285_v15, 1  ;;  %v2236_v39 = vcombine.low %v2722_v40, %v1170_v28  ;;  %2383 = vmatprep.subr.msk.bf16.mxu1 %vm3559_vm8, %v2438_v8 }
  0xfd   : > { %v743_v1 = vmax.f32 %v678_v16, 0.0  ;;  %v1765_v16 = vsel %vm3559_vm8, %v2438_v8, 0  ;;  %v1259_v24 = vsel %vm1216_vm5, %v2843_v60, 0  ;;  %vm2993_vm5 = vcmp.gt.s32.totalorder %v873_v7, 0 }
  0xfe   : > { %1470 = vrot.lane.b32.xlu0 %v1455_v25, %s2505_s28  ;;  %1382 = vrot.lane.b32.xlu1 %v1367_v30, %s2502_s24  ;;  %v682_v33 = vpop.f32.mrf.mxu0  ;;  %v1288_v47 = vsel %vm1268_vm10, %v1283_v36, %v1287_v31  ;;  %v2938_v2 = vrot.slane %v2236_v39, 7  ;;  %v1291_v15 = vor.u32 %v1289_v20, %v1287_v31  ;;  %v783_v39 = vadd.s32 112, %v2695_v22  ;;  %vm1053_vm14 = vmpackc.low %vm2993_vm5, %vm2993_vm5 }
  0xff   : > { %v2903_v35 = vpack.c.bf16 %v743_v1, %v742_v29  ;;  %v683_v52 = vadd.f32 %v2709_v32, %v682_v33  ;;  %2342 = vmatpush3.bf16.msra.mxu1 %v1765_v16  ;;  %v1067_v29 = vsel %vm1051_vm15, 65537, %v2500_v34  ;;  %v2439_v1 = vld [vmem:[%s3554_s5 + $0x8] sm:$0xff]   ;;  %vm1668_vm1 = vcmask 195584  }
 0x100   : > { %v2315_v41 = vpop.f32.mrf.mxu0  ;;  %v2968_v6 = vsel %vm3561_vm2, %v1206_v37, %v2938_v2  ;;  %2343 = vmatprep.subr.bf16.mxu1 %v2439_v1  ;;  %v2229_v46 = vcombine.low %v1067_v29, %v2722_v40  ;;  %v887_v20 = vand.u32 15, %v783_v39 }
 0x101   : > { %v1252_v49 = vsel %vm2775_vm7, %v2903_v35, 0  ;;  %v2919_v45 = vsel %vm1218_vm0, %v2903_v35, 0  ;;  %v1293_v51 = vshll.u32 %v2903_v35, 16  ;;  %v1108_v4 = vsel %vm2905_vm13, %v2903_v35, 0 }
 0x102   : > { %1339 = vrot.lane.b32.xlu0 %v1288_v47, %s2503_s26  ;;  %1496 = vrot.lane.b32.xlu1 %v1252_v49, %s2504_s27  ;;  %v685_v53 = vpop.f32.mrf.mxu0  ;;  %v1456_v55 = vrot.slane %v2919_v45, 1  ;;  %v744_v9 = vmax.f32 %v683_v52, 0.0  ;;  %v1236_v28 = vsel %vm2849_vm3, %v2903_v35, 0  ;;  %v1228_v36 = vsel %vm1219_vm11, %v2903_v35, 0 }
 0x103   : > { %v686_v56 = vadd.f32 %v2709_v32, %v685_v53  ;;  %v2945_v5 = vrot.slane %v1293_v51, 1  ;;  %v1543_v41 = vrot.slane %v1259_v24, 1  ;;  %vm1220_vm12 = vcmp.ne.s16.totalorder %v2968_v6, 0  ;;  %2344 = vmatpush3.bf16.msra.mxu1 %v2439_v1  ;;  %v2440_v51 = vld [vmem:[%s3554_s5] sm:$0xff]  }
 0x104   : > { %v2316_v61 = vpop.f32.mrf.mxu0  ;;  %v1457_v62 = vsel %vm1362_vm9, %v1454_v13, %v1456_v55  ;;  %v2955_v13 = vsel %vm1217_vm6, %v2903_v35, 0  ;;  %vm2970_vm6 = vcmp.ne.s16.totalorder %v2228_v3, 0  ;;  %v1368_v49 = vrot.slane %v1228_v36, 1  ;;  %2345 = vmatprep.subr.bf16.mxu1 %v2440_v51 }
 0x105   : > { %v745_v11 = vmax.f32 %v686_v56, 0.0  ;;  %v1296_v27 = vsel %vm1268_vm10, %v1291_v15, %v2945_v5  ;;  %v1544_v63 = vrot.slane %v2955_v13, 1  ;;  %v782_v3 = vadd.s32 104, %v2695_v22 }
 0x106   : > { %1428 = vrot.lane.b32.xlu0 %v1288_v47, %s2506_s16  ;;  %1472 = vrot.lane.b32.xlu1 %v1457_v62, %s2505_s28  ;;  %v690_v12 = vpop.f32.mrf.mxu0  ;;  %v866_v62 = vand.u32 15, %v780_v26  ;;  %vm3021_vm15 = vcmp.ne.s16.totalorder %v2229_v46, 0  ;;  %vm1746_vm7 = vcmask 293888  }
 0x107   : > { %v2985_v30 = vpack.c.bf16 %v745_v11, %v744_v9  ;;  %v691_v31 = vadd.f32 %v2709_v32, %v690_v12  ;;  %v1545_v47 = vsel %vm1362_vm9, %v1543_v41, %v1544_v63  ;;  %v1069_v9 = vsel %vm1053_vm14, 65537, %v2500_v34  ;;  %2346 = vmatpush3.bf16.msra.mxu1 %v2440_v51 }
 0x108   : > { %v2319_v19 = vpop.f32.mrf.mxu0  ;;  %v1369_v11 = vsel %vm1362_vm9, %v1366_v17, %v1368_v49  ;;  %vm3044_vm5 = vcmp.lt.s32.totalorder %v866_v62, 15  ;;  %v784_v17 = vadd.s32 120, %v2695_v22  ;;  %v880_v29 = vand.u32 15, %v782_v3 }
 0x109   : > { %v1109_v52 = vsel %vm2970_vm6, %v2985_v30, 0  ;;  %v746_v53 = vmax.f32 %v691_v31, 0.0  ;;  %v3018_v61 = vsel %vm1220_vm12, %v2985_v30, 0  ;;  %v1237_v12 = vsel %vm2905_vm13, %v2985_v30, 0  ;;  %vm1156_vm8 = vmpackc.low %vm3044_vm5, %vm3044_vm5 }
 0x10a   : > { %1430 = vrot.lane.b32.xlu1 %v1296_v27, %s2506_s16  ;;  %1408 = vrot.lane.b32.xlu0 %v1236_v28, %s2501_s23  ;;  %v693_v33 = vpop.f32.mrf.mxu0  ;;  %v1370_v15 = vrot.slane %v3018_v61, 1  ;;  %v1301_v16 = vshll.u32 %v2985_v30, 16  ;;  %vm3050_vm14 = vcmp.gt.s32.totalorder %v887_v20, 0  ;;  %v1297_v22 = vshrl.u32 %v2903_v35, 16 }
 0x10b   : > { %v694_v38 = vadd.f32 %v2709_v32, %v693_v33  ;;  %v2230_v33 = vcombine.low %v1069_v9, %v2722_v40  ;;  %vm1055_vm4 = vmpackc.low %vm3050_vm14, %vm3050_vm14  ;;  %vm3078_vm5 = vcmp.lt.s32.totalorder %v880_v29, 15  ;;  %v1253_v48 = vsel %vm2849_vm3, %v2985_v30, 0 }
 0x10c   : > { %v2320_v44 = vpop.f32.mrf.mxu0  ;;  %v1371_v37 = vsel %vm1362_vm9, %v1368_v49, %v1370_v15  ;;  %v1299_v49 = vor.u32 %v1297_v22, %v2945_v5  ;;  %v1071_v62 = vsel %vm1055_vm4, 65537, %v2500_v34  ;;  %v1245_v20 = vsel %vm1219_vm11, %v2985_v30, 0 }
 0x10d   : > { %v747_v56 = vmax.f32 %v694_v38, 0.0  ;;  %v3062_v38 = vrot.slane %v1301_v16, 1  ;;  %v3072_v44 = vsel %vm1218_vm0, %v2985_v30, 0  ;;  %vm3083_vm2 = vcmp.ne.s16.totalorder %v2230_v33, 0  ;;  %vm1158_vm0 = vmpackc.low %vm3078_vm5, %vm3078_vm5 }
 0x10e   : > { %1341 = vrot.lane.b32.xlu1 %v1296_v27, %s2503_s26  ;;  %1560 = vrot.lane.b32.xlu0 %v1545_v47, %s2507_s20  ;;  %v698_v57 = vpop.f32.mrf.mxu0  ;;  %v894_v47 = vand.u32 15, %v784_v17  ;;  %v1546_v5 = vrot.slane %v3072_v44, 1  ;;  %v1174_v29 = vsel %vm1158_vm0, 65537, %v2500_v34  ;;  %vm3608_vm5 = vcmask 1040384  }
 0x10f   : > { %v3039_v19 = vpack.c.bf16 %v747_v56, %v746_v53  ;;  %v699_v24 = vadd.f32 %v2709_v32, %v698_v57  ;;  %v1172_v53 = vsel %vm1156_vm8, 65537, %v2500_v34  ;;  %v1304_v57 = vsel %vm1268_vm10, %v1299_v49, %v3062_v38 }
 0x110   : > { %v2323_v7 = vpop.f32.mrf.mxu0  ;;  %vm3105_vm8 = vcmp.lt.s32.totalorder %v894_v47, 15  ;;  %v2237_v16 = vcombine.low %v2722_v40, %v1172_v53  ;;  %v1547_v17 = vsel %vm1362_vm9, %v1544_v63, %v1546_v5  ;;  %v2238_v22 = vcombine.low %v2722_v40, %v1174_v29 }
 0x111   : > { %v1110_v36 = vsel %vm3021_vm15, %v3039_v19, 0  ;;  %v748_v41 = vmax.f32 %v699_v24, 0.0  ;;  %vm1160_vm4 = vmpackc.low %vm3105_vm8, %vm3105_vm8  ;;  %v1254_v49 = vsel %vm2905_vm13, %v3039_v19, 0  ;;  %v1238_v54 = vsel %vm2970_vm6, %v3039_v19, 0 }
 0x112   : > { %1384 = vrot.lane.b32.xlu0 %v1369_v11, %s2502_s24  ;;  %1410 = vrot.lane.b32.xlu1 %v1237_v12, %s2501_s23  ;;  %v701_v26 = vpop.f32.mrf.mxu0  ;;  %v1210_v63 = vrot.slane %v2237_v16, 7  ;;  %vm3609_vm8 = vmmov %vm3608_vm5 }
 0x113   : > { %v702_v28 = vadd.f32 %v2709_v32, %v701_v26  ;;  %v2231_v26 = vcombine.low %v1071_v62, %v2722_v40 }
 0x114   : > { %v2324_v31 = vpop.f32.mrf.mxu0  ;;  %v3158_v45 = vsel %vm3608_vm5, %v2938_v2, %v1210_v63  ;;  %v1262_v2 = vsel %vm1219_vm11, %v3039_v19, 0 }
 0x115   : > { %v749_v39 = vmax.f32 %v702_v28, 0.0  ;;  %v1458_v28 = vrot.slane %v1245_v20, 1  ;;  %v3129_v31 = vsel %vm1220_vm12, %v3039_v19, 0  ;;  %vm3135_vm14 = vcmp.ne.s16.totalorder %v2231_v26, 0 }
 0x116   : > { %1518 = vrot.lane.b32.xlu0 %v1296_v27, %s2508_s29  ;;  %1386 = vrot.lane.b32.xlu1 %v1371_v37, %s2502_s24  ;;  %v706_v46 = vpop.f32.mrf.mxu0  ;;  %v1460_v51 = vrot.slane %v3129_v31, 1  ;;  %vm1221_vm0 = vcmp.ne.s16.totalorder %v3158_v45, 0  ;;  %v1548_v29 = vrot.slane %v1262_v2, 1 }
 0x117   : > { %v3094_v3 = vpack.c.bf16 %v749_v39, %v748_v41  ;;  %v707_v7 = vadd.f32 %v2709_v32, %v706_v46  ;;  %v1176_v41 = vsel %vm1160_vm4, 65537, %v2500_v34  ;;  %v731_v46 = vadd.f32 %v2709_v32, %v2740_v50 }
 0x118   : > { %v2327_v27 = vpop.f32.mrf.mxu0  ;;  %v1459_v47 = vsel %vm1362_vm9, %v1456_v55, %v1458_v28  ;;  %v1305_v50 = vshrl.u32 %v2985_v30, 16  ;;  %v1212_v55 = vrot.slane %v2238_v22, 7  ;;  %v2239_v62 = vcombine.low %v2722_v40, %v1176_v41 }
 0x119   : > { %v1111_v14 = vsel %vm3083_vm2, %v3094_v3, 0  ;;  %v750_v1 = vmax.f32 %v707_v7, 0.0  ;;  %v1309_v27 = vshll.u32 %v3039_v19, 16  ;;  %v756_v20 = vmax.f32 %v731_v46, 0.0 }
 0x11a   : > { %1498 = vrot.lane.b32.xlu0 %v1253_v48, %s2504_s27  ;;  %1520 = vrot.lane.b32.xlu1 %v1304_v57, %s2508_s29  ;;  %v709_v9 = vpop.f32.mrf.mxu0  ;;  %v1549_v41 = vsel %vm1362_vm9, %v1546_v5, %v1548_v29 }
 0x11b   : > { %v710_v12 = vadd.f32 %v2709_v32, %v709_v9  ;;  %v1461_v9 = vsel %vm1362_vm9, %v1458_v28, %v1460_v51  ;;  %v1311_v11 = vrot.slane %v1309_v27, 1 }
 0x11c   : > { %v2328_v24 = vpop.f32.mrf.mxu0 }
 0x11d   : > { %v751_v13 = vmax.f32 %v710_v12, 0.0  ;;  %v1307_v12 = vor.u32 %v1305_v50, %v3062_v38  ;;  %v3176_v24 = vsel %vm3609_vm8, %v1210_v63, %v1212_v55  ;;  %v1230_v38 = vsel %vm1221_vm0, %v3039_v19, 0 }
 0x11e   : > { %1562 = vrot.lane.b32.xlu0 %v1547_v17, %s2507_s20  ;;  %1343 = vrot.lane.b32.xlu1 %v1304_v57, %s2503_s26  ;;  %v3131_v33 = vpop.f32.mrf.mxu0  ;;  %v3178_v17 = vrot.slane %v2239_v62, 7  ;;  %vm1222_vm11 = vcmp.ne.s16.totalorder %v3176_v24, 0  ;;  %v1313_v50 = vshrl.u32 %v3039_v19, 16 }
 0x11f   : > { %v3151_v34 = vpack.c.bf16 %v751_v13, %v750_v1  ;;  %v1312_v28 = vsel %vm1268_vm10, %v1307_v12, %v1311_v11  ;;  %v3209_v27 = vsel %vm1222_vm11, %v3094_v3, 0 }
 0x120   : > { %v2331_v37 = vpop.f32.mrf.mxu0  ;;  %vm1224_vm4 = vcmp.ne.s16.totalorder %v3178_v17, 0  ;;  %v1374_v62 = vrot.slane %v3209_v27, 1 }
 0x121   : > { %v1112_v7 = vsel %vm3135_vm14, %v3151_v34, 0  ;;  %v1372_v37 = vrot.slane %v1230_v38, 1  ;;  %v1248_v6 = vsel %vm1222_vm11, %v3151_v34, 0 }
 0x122   : > { %1474 = vrot.lane.b32.xlu0 %v1459_v47, %s2505_s28  ;;  %1500 = vrot.lane.b32.xlu1 %v1254_v49, %s2504_s27  ;;  %v3153_v53 = vpop.f32.mrf.mxu0  ;;  %v3199_v47 = vsel %vm3608_vm5, %v1212_v55, %v3178_v17  ;;  %vm1702_vm5 = vcmask 261120  }
 0x123   : > { %v1373_v5 = vsel %vm1362_vm9, %v1370_v15, %v1372_v37  ;;  %vm1223_vm8 = vcmp.ne.s16.totalorder %v3199_v47, 0  ;;  %v1375_v2 = vsel %vm1362_vm9, %v1372_v37, %v1374_v62  ;;  %v1256_v37 = vsel %vm3021_vm15, %v3151_v34, 0 }
 0x124   : > { %v2332_v48 = vpop.f32.mrf.mxu0 }
 0x125   : > { %v1239_v48 = vsel %vm3021_vm15, %v3094_v3, 0 }
 0x126   : > { %1432 = vrot.lane.b32.xlu0 %v1304_v57, %s2506_s16  ;;  %1476 = vrot.lane.b32.xlu1 %v1461_v9, %s2505_s28  ;;  %v722_v40 = vpop.f32.mrf.mxu0  ;;  %v3180_v57 = vpack.c.bf16 %v756_v20, %v756_v20  ;;  %v1317_v20 = vshll.u32 %v3094_v3, 16 }
 0x127   : > { %v723_v16 = vadd.f32 %v2709_v32, %v722_v40  ;;  %v1315_v40 = vor.u32 %v1313_v50, %v1311_v11  ;;  %v1247_v11 = vsel %vm1221_vm0, %v3094_v3, 0 }
 0x128   : > { %v2335_v26 = vpop.f32.mrf.mxu0  ;;  %v1267_v49 = vsel %vm1224_vm4, %v3180_v57, 0  ;;  %v1319_v12 = vrot.slane %v1317_v20, 1 }
 0x129   : > { %v754_v13 = vmax.f32 %v723_v16, 0.0  ;;  %v1558_v55 = vrot.slane %v1267_v49, 1  ;;  %v1263_v16 = vsel %vm1220_vm12, %v3094_v3, 0  ;;  %v1255_v26 = vsel %vm2970_vm6, %v3094_v3, 0 }
 0x12a   : > { %1434 = vrot.lane.b32.xlu1 %v1312_v28, %s2506_s16  ;;  %1412 = vrot.lane.b32.xlu0 %v1238_v54, %s2501_s23  ;;  %v725_v1 = vpop.f32.mrf.mxu0  ;;  %v1320_v54 = vsel %vm1268_vm10, %v1315_v40, %v1319_v12  ;;  %v1550_v38 = vrot.slane %v1263_v16, 1  ;;  %v1329_v40 = vshrl.u32 %v3151_v34, 16  ;;  %vm1576_vm12 = vcmask 31744  }
 0x12b   : > { %v726_v63 = vadd.f32 %v2709_v32, %v725_v1  ;;  %v1462_v1 = vrot.slane %v1247_v11, 1 }
 0x12c   : > { %v2336_v22 = vpop.f32.mrf.mxu0 }
 0x12d   : > { %v755_v46 = vmax.f32 %v726_v63, 0.0  ;;  %v1463_v63 = vsel %vm1362_vm9, %v1460_v51, %v1462_v1  ;;  %v1325_v22 = vshll.u32 %v3151_v34, 16 }
 0x12e   : > { %1345 = vrot.lane.b32.xlu1 %v1312_v28, %s2503_s26  ;;  %1564 = vrot.lane.b32.xlu0 %v1549_v41, %s2507_s20  ;;  %v715_v41 = vadd.f32 %v2709_v32, %v3131_v33  ;;  %v1264_v33 = vsel %vm1221_vm0, %v3151_v34, 0  ;;  %vm1601_vm0 = vcmask 64512  }
 0x12f   : > { %v3211_v44 = vpack.c.bf16 %v755_v46, %v754_v13  ;;  %v1321_v13 = vshrl.u32 %v3094_v3, 16  ;;  %v718_v46 = vadd.f32 %v2709_v32, %v3153_v53  ;;  %v1327_v49 = vrot.slane %v1325_v22, 1 }
 0x130   : > { %v752_v27 = vmax.f32 %v715_v41, 0.0  ;;  %v1240_v53 = vsel %vm3083_vm2, %v3151_v34, 0  ;;  %v1552_v50 = vrot.slane %v1264_v33, 1 }
 0x131   : > { %v3226_v9 = vsel %vm1223_vm8, %v3211_v44, 0  ;;  %v1323_v51 = vor.u32 %v1321_v13, %v1319_v12  ;;  %v1331_v11 = vor.u32 %v1329_v40, %v1327_v49  ;;  %v1250_v24 = vsel %vm1224_vm4, %v3211_v44, 0 }
 0x132   : > { %1388 = vrot.lane.b32.xlu0 %v1373_v5, %s2502_s24  ;;  %1414 = vrot.lane.b32.xlu1 %v1239_v48, %s2501_s23  ;;  %v1556_v61 = vrot.slane %v3226_v9, 1  ;;  %v753_v5 = vmax.f32 %v718_v46, 0.0  ;;  %v1232_v48 = vsel %vm1223_vm8, %v3151_v34, 0  ;;  %v1553_v20 = vsel %vm1362_vm9, %v1550_v38, %v1552_v50 }
 0x133   : > { %v1328_v32 = vsel %vm1268_vm10, %v1323_v51, %v1327_v49  ;;  %v1376_v45 = vrot.slane %v1232_v48, 1  ;;  %v1468_v47 = vrot.slane %v1250_v24, 1  ;;  %v1424_v51 = vshll.u32 %v3211_v44, 16 }
 0x134   : > { %v3234_v15 = vsel %vm1362_vm9, %v1556_v61, %v1558_v55  ;;  %v765_v55 = vpack.c.bf16 %v753_v5, %v752_v27  ;;  %v1514_v49 = vshll.u32 %v3180_v57, 16 }
 0x135   : > { %v1377_v12 = vsel %vm1362_vm9, %v1374_v62, %v1376_v45  ;;  %v1426_v33 = vrot.slane %v1424_v51, 1 }
 0x136   : > { %1522 = vrot.lane.b32.xlu0 %v1312_v28, %s2508_s29  ;;  %1390 = vrot.lane.b32.xlu1 %v1375_v2, %s2502_s24  ;;  %v1551_v28 = vsel %vm1362_vm9, %v1548_v29, %v1550_v38  ;;  %v1464_v29 = vrot.slane %v1248_v6, 1  ;;  %v1233_v2 = vsel %vm1224_vm4, %v765_v55, 0  ;;  %v1241_v16 = vsel %vm3135_vm14, %v765_v55, 0 }
 0x137   : > { %v1265_v62 = vsel %vm1222_vm11, %v765_v55, 0  ;;  %v1420_v41 = vshrl.u32 %v765_v55, 16  ;;  %vm3610_vm11 = vcmask 130048   ;;  %vm1685_vm4 = vcmask 228352  }
 0x138   : > { %v1465_v31 = vsel %vm1362_vm9, %v1462_v1, %v1464_v29  ;;  %v1257_v1 = vsel %vm3083_vm2, %v765_v55, 0  ;;  %v1554_v13 = vrot.slane %v1265_v62, 1 }
 0x13a   : > { %1502 = vrot.lane.b32.xlu0 %v1255_v26, %s2504_s27  ;;  %1524 = vrot.lane.b32.xlu1 %v1320_v54, %s2508_s29  ;;  %v1378_v26 = vrot.slane %v1233_v2, 1 }
 0x13c   : > { %v1379_v38 = vsel %vm1362_vm9, %v1376_v45, %v1378_v26 }
 0x13e   : > { %1566 = vrot.lane.b32.xlu0 %v1551_v28, %s2507_s20  ;;  %1347 = vrot.lane.b32.xlu1 %v1320_v54, %s2503_s26 }
 0x142   : > { %1478 = vrot.lane.b32.xlu0 %v1463_v63, %s2505_s28  ;;  %1504 = vrot.lane.b32.xlu1 %v1256_v37, %s2504_s27  ;;  %v1249_v63 = vsel %vm1223_vm8, %v765_v55, 0  ;;  %v1555_v37 = vsel %vm1362_vm9, %v1552_v50, %v1554_v13  ;;  %v1516_v50 = vrot.slane %v1514_v49, 1  ;;  %vm3611_vm8 = vmmov %vm3610_vm11 }
 0x143   : > { %v1466_v22 = vrot.slane %v1249_v63, 1  ;;  %vm3613_vm3 = vmmov %vm3611_vm8 }
 0x144   : > { %vm3614_vm13 = vmmov %vm3613_vm3 }
 0x145   : > { %v1467_v46 = vsel %vm1362_vm9, %v1464_v29, %v1466_v22  ;;  %v1469_v17 = vsel %vm1362_vm9, %v1466_v22, %v1468_v47  ;;  %v1510_v29 = vshrl.u32 %v3211_v44, 16  ;;  %vm3615_vm6 = vmmov %vm3613_vm3 }
 0x146   : > { %1436 = vrot.lane.b32.xlu0 %v1320_v54, %s2506_s16  ;;  %1480 = vrot.lane.b32.xlu1 %v1465_v31, %s2505_s28  ;;  %v1333_v54 = vshll.u32 %v765_v55, 16  ;;  %v1258_v31 = vsel %vm3135_vm14, %v3211_v44, 0  ;;  %v1557_v44 = vsel %vm1362_vm9, %v1554_v13, %v1556_v61  ;;  %vm1618_vm9 = vcmask 97280   ;;  %vm3616_vm15 = vmmov %vm3613_vm3 }
 0x147   : > { %v1512_v48 = vor.u32 %v1510_v29, %v1426_v33  ;;  %vm3617_vm2 = vmmov %vm3613_vm3  ;;  %vm3618_vm14 = vcmask 1041408  }
 0x148   : > { %v1335_v28 = vrot.slane %v1333_v54, 1 }
 0x149   : > { %v1517_v45 = vsel %vm1268_vm10, %v1512_v48, %v1516_v50 }
 0x14a   : > { %1438 = vrot.lane.b32.xlu1 %v1328_v32, %s2506_s16  ;;  %1416 = vrot.lane.b32.xlu0 %v1240_v53, %s2501_s23  ;;  %v1336_v6 = vsel %vm1268_vm10, %v1331_v11, %v1335_v28  ;;  %v1422_v5 = vor.u32 %v1420_v41, %v1335_v28 }
 0x14c   : > { %v1427_v55 = vsel %vm1268_vm10, %v1422_v5, %v1426_v33  ;;  %vm1651_vm10 = vcmask 162816  }
 0x14e   : > { %1349 = vrot.lane.b32.xlu1 %v1328_v32, %s2503_s26  ;;  %1568 = vrot.lane.b32.xlu0 %v1553_v20, %s2507_s20 }
 0x152   : > { %1392 = vrot.lane.b32.xlu0 %v1377_v12, %s2502_s24  ;;  %1418 = vrot.lane.b32.xlu1 %v1241_v16, %s2501_s23 }
 0x156   : > { %1526 = vrot.lane.b32.xlu0 %v1328_v32, %s2508_s29  ;;  %1394 = vrot.lane.b32.xlu1 %v1379_v38, %s2502_s24 }
 0x15a   : > { %1506 = vrot.lane.b32.xlu0 %v1257_v1, %s2504_s27  ;;  %1528 = vrot.lane.b32.xlu1 %v1336_v6, %s2508_s29 }
 0x15e   : > { %1570 = vrot.lane.b32.xlu0 %v1555_v37, %s2507_s20  ;;  %1351 = vrot.lane.b32.xlu1 %v1336_v6, %s2503_s26 }
 0x162   : > { %1482 = vrot.lane.b32.xlu0 %v1467_v46, %s2505_s28  ;;  %1508 = vrot.lane.b32.xlu1 %v1258_v31, %s2504_s27 }
 0x164   : > { %v1405_v27 = vpop.permute.xlu0 %1404 }
 0x166   : > { %1440 = vrot.lane.b32.xlu0 %v1336_v6, %s2506_s16  ;;  %1484 = vrot.lane.b32.xlu1 %v1469_v17, %s2505_s28 }
 0x167   : > { %v1381_v32 = vpop.permute.xlu1 %1380 }
 0x168   : > { %v1338_v53 = vpop.permute.xlu0 %1337 }
 0x169   : > { %v1579_v9 = vsel %vm1576_vm12, %v1105_v10, %v1338_v53 }
 0x16a   : > { %1530 = vrot.lane.b32.xlu0 %v1427_v55, %s2508_s29  ;;  %1442 = vrot.lane.b32.xlu1 %v1427_v55, %s2506_s16  ;;  %v1603_v11 = vsel %vm1601_vm0, %v1579_v9, %v1381_v32 }
 0x16c   : > { %v1495_v57 = vpop.permute.xlu0 %1494  ;;  %v1407_v20 = vpop.permute.xlu1 %1406 }
 0x16e   : > { %1572 = vrot.lane.b32.xlu0 %v1557_v44, %s2507_s20  ;;  %1532 = vrot.lane.b32.xlu1 %v1517_v45, %s2508_s29 }
 0x170   : > { %v1471_v2 = vpop.permute.xlu0 %1470  ;;  %v1383_v40 = vpop.permute.xlu1 %1382 }
 0x172   : > { %1574 = vrot.lane.b32.xlu1 %v3234_v15, %s2507_s20  ;;  %v1620_v15 = vsel %vm1618_vm9, %v1603_v11, %v1405_v27 }
 0x174   : > { %v1340_v12 = vpop.permute.xlu0 %1339  ;;  %v1497_v16 = vpop.permute.xlu1 %1496 }
 0x175   : > { %v1582_v1 = vsel %vm1576_vm12, %v1106_v42, %v1340_v12 }
 0x176   : > { %v1605_v6 = vsel %vm1601_vm0, %v1582_v1, %v1383_v40 }
 0x177   : > { %v1622_v63 = vsel %vm1618_vm9, %v1605_v6, %v1407_v20 }
 0x178   : > { %v1429_v26 = vpop.permute.xlu0 %1428  ;;  %v1473_v54 = vpop.permute.xlu1 %1472 }
 0x179   : > { %v1636_v58 = vsel %vm3610_vm11, %v1620_v15, %v1429_v26  ;;  %vm3612_vm11 = vmmov %vm3611_vm8 }
 0x17a   : > { %v1653_v13 = vsel %vm1651_vm10, %v1636_v58, %v1471_v2 }
 0x17b   : > { %v1670_v18 = vsel %vm1668_vm1, %v1653_v13, %v1495_v57 }
 0x17c   : > { %v1431_v61 = vpop.permute.xlu1 %1430  ;;  %v1409_v38 = vpop.permute.xlu0 %1408 }
 0x17d   : > { %v1638_v42 = vsel %vm3611_vm8, %v1622_v63, %v1431_v61 }
 0x17e   : > { %v1655_v41 = vsel %vm1651_vm10, %v1638_v42, %v1473_v54 }
 0x17f   : > { %v1672_v47 = vsel %vm1668_vm1, %v1655_v41, %v1497_v16 }
 0x180   : > { %v1342_v28 = vpop.permute.xlu1 %1341  ;;  %v1561_v62 = vpop.permute.xlu0 %1560 }
 0x181   : > { %v1585_v55 = vsel %vm1576_vm12, %v1107_v21, %v1342_v28 }
 0x184   : > { %v1385_v59 = vpop.permute.xlu0 %1384  ;;  %v1411_v10 = vpop.permute.xlu1 %1410 }
 0x185   : > { %v1607_v48 = vsel %vm1601_vm0, %v1585_v55, %v1385_v59 }
 0x186   : > { %v1624_v44 = vsel %vm1618_vm9, %v1607_v48, %v1409_v38 }
 0x188   : > { %v1519_v37 = vpop.permute.xlu0 %1518  ;;  %v1387_v23 = vpop.permute.xlu1 %1386 }
 0x189   : > { %v1687_v22 = vsel %vm1685_vm4, %v1670_v18, %v1519_v37 }
 0x18a   : > { %v1704_v24 = vsel %vm1702_vm5, %v1687_v22, %v1561_v62 }
 0x18b   : > { %2347 = vmatprep.mubr.msk.bf16.mxu1 %vm1746_vm7, %v1704_v24 }
 0x18c   : > { %v1499_v46 = vpop.permute.xlu0 %1498  ;;  %v1521_v31 = vpop.permute.xlu1 %1520 }
 0x18d   : > { %v1689_v51 = vsel %vm1685_vm4, %v1672_v47, %v1521_v31 }
 0x190   : > { %v1563_v49 = vpop.permute.xlu0 %1562  ;;  %v1344_v27 = vpop.permute.xlu1 %1343 }
 0x191   : > { %v1706_v17 = vsel %vm1702_vm5, %v1689_v51, %v1563_v49  ;;  %v1588_v45 = vsel %vm1576_vm12, %v1108_v4, %v1344_v27 }
 0x192   : > { %2348 = vmatmul.mubr.msk.bf16.vlgmr.msra.gmra.mxu1 %vm1746_vm7, %v1706_v17  ;;  %v1609_v60 = vsel %vm1601_vm0, %v1588_v45, %v1387_v23 }
 0x193   : > { %v1626_v12 = vsel %vm1618_vm9, %v1609_v60, %v1411_v10 }
 0x194   : > { %v1475_v5 = vpop.permute.xlu0 %1474  ;;  %v1501_v33 = vpop.permute.xlu1 %1500 }
 0x198   : > { %v1433_v29 = vpop.permute.xlu0 %1432  ;;  %v1477_v32 = vpop.permute.xlu1 %1476 }
 0x199   : > { %v1640_v2 = vsel %vm3612_vm11, %v1624_v44, %v1433_v29 }
 0x19a   : > { %v1657_v21 = vsel %vm1651_vm10, %v1640_v2, %v1475_v5 }
 0x19b   : > { %v1674_v16 = vsel %vm1668_vm1, %v1657_v21, %v1499_v46 }
 0x19c   : > { %v1435_v53 = vpop.permute.xlu1 %1434  ;;  %v1413_v50 = vpop.permute.xlu0 %1412 }
 0x19d   : > { %v1642_v43 = vsel %vm3613_vm3, %v1626_v12, %v1435_v53 }
 0x19e   : > { %v1659_v9 = vsel %vm1651_vm10, %v1642_v43, %v1477_v32 }
 0x19f   : > { %v1676_v11 = vsel %vm1668_vm1, %v1659_v9, %v1501_v33 }
 0x1a0   : > { %v1346_v57 = vpop.permute.xlu1 %1345  ;;  %v1565_v20 = vpop.permute.xlu0 %1564 }
 0x1a1   : > { %v1591_v18 = vsel %vm1576_vm12, %v1109_v52, %v1346_v57 }
 0x1a4   : > { %v1389_v40 = vpop.permute.xlu0 %1388  ;;  %v1415_v0 = vpop.permute.xlu1 %1414 }
 0x1a5   : > { %v1611_v37 = vsel %vm1601_vm0, %v1591_v18, %v1389_v40 }
 0x1a6   : > { %v1628_v22 = vsel %vm1618_vm9, %v1611_v37, %v1413_v50 }
 0x1a8   : > { %v1523_v26 = vpop.permute.xlu0 %1522  ;;  %v1391_v54 = vpop.permute.xlu1 %1390 }
 0x1a9   : > { %v1691_v35 = vsel %vm1685_vm4, %v1674_v16, %v1523_v26 }
 0x1aa   : > { %v1708_v4 = vsel %vm1702_vm5, %v1691_v35, %v1565_v20 }
 0x1ab   : > { %2351 = vmatprep.mubr.msk.bf16.mxu1 %vm1746_vm7, %v1708_v4 }
 0x1ac   : > { %v1503_v61 = vpop.permute.xlu0 %1502  ;;  %v1525_v38 = vpop.permute.xlu1 %1524 }
 0x1ad   : > { %v1693_v28 = vsel %vm1685_vm4, %v1676_v11, %v1525_v38 }
 0x1b0   : > { %v1567_v62 = vpop.permute.xlu0 %1566  ;;  %v1348_v15 = vpop.permute.xlu1 %1347 }
 0x1b1   : > { %v1710_v1 = vsel %vm1702_vm5, %v1693_v28, %v1567_v62  ;;  %v1594_v24 = vsel %vm1576_vm12, %v1110_v36, %v1348_v15  ;;  %v2240_v62 = vld [vmem:[%s3555_s6] ss:$0 sm:$0xff] }
 0x1b2   : > { %2352 = vmatmul.mubr.msk.bf16.gmra.mxu1 %vm1746_vm7, %v1710_v1  ;;  %v1613_v30 = vsel %vm1601_vm0, %v1594_v24, %v1391_v54 }
 0x1b3   : > { %v1630_v31 = vsel %vm1618_vm9, %v1613_v30, %v1415_v0 }
 0x1b4   : > { %v1479_v58 = vpop.permute.xlu0 %1478  ;;  %v1505_v59 = vpop.permute.xlu1 %1504 }
 0x1b8   : > { %v1437_v10 = vpop.permute.xlu0 %1436  ;;  %v1481_v6 = vpop.permute.xlu1 %1480 }
 0x1b9   : > { %v1644_v41 = vsel %vm3614_vm13, %v1628_v22, %v1437_v10 }
 0x1ba   : > { %v1661_v52 = vsel %vm1651_vm10, %v1644_v41, %v1479_v58 }
 0x1bb   : > { %v1678_v47 = vsel %vm1668_vm1, %v1661_v52, %v1503_v61 }
 0x1bc   : > { %v1439_v13 = vpop.permute.xlu1 %1438  ;;  %v1417_v63 = vpop.permute.xlu0 %1416 }
 0x1bd   : > { %v1646_v8 = vsel %vm3615_vm6, %v1630_v31, %v1439_v13 }
 0x1be   : > { %v1663_v27 = vsel %vm1651_vm10, %v1646_v8, %v1481_v6 }
 0x1bf   : > { %v1680_v33 = vsel %vm1668_vm1, %v1663_v27, %v1505_v59 }
 0x1c0   : > { %v1350_v23 = vpop.permute.xlu1 %1349  ;;  %v1569_v42 = vpop.permute.xlu0 %1568 }
 0x1c1   : > { %v1597_v55 = vsel %vm1576_vm12, %v1111_v14, %v1350_v23 }
 0x1c4   : > { %v1393_v46 = vpop.permute.xlu0 %1392  ;;  %v1419_v25 = vpop.permute.xlu1 %1418 }
 0x1c5   : > { %v1615_v20 = vsel %vm1601_vm0, %v1597_v55, %v1393_v46 }
 0x1c6   : > { %v1632_v45 = vsel %vm1618_vm9, %v1615_v20, %v1417_v63 }
 0x1c8   : > { %v1527_v51 = vpop.permute.xlu0 %1526  ;;  %v1395_v49 = vpop.permute.xlu1 %1394 }
 0x1c9   : > { %v1695_v19 = vsel %vm1685_vm4, %v1678_v47, %v1527_v51 }
 0x1ca   : > { %v1712_v36 = vsel %vm1702_vm5, %v1695_v19, %v1569_v42 }
 0x1cb   : > { %2355 = vmatprep.mubr.msk.bf16.mxu1 %vm1746_vm7, %v1712_v36 }
 0x1cc   : > { %v1507_v17 = vpop.permute.xlu0 %1506  ;;  %v1529_v5 = vpop.permute.xlu1 %1528 }
 0x1cd   : > { %v1697_v29 = vsel %vm1685_vm4, %v1680_v33, %v1529_v5 }
 0x1d0   : > { %v1571_v32 = vpop.permute.xlu0 %1570  ;;  %v1352_v53 = vpop.permute.xlu1 %1351 }
 0x1d1   : > { %v1714_v50 = vsel %vm1702_vm5, %v1697_v29, %v1571_v32  ;;  %v1600_v44 = vsel %vm1576_vm12, %v1112_v7, %v1352_v53  ;;  %v1888_v7 = vld [vmem:[%s3556_s7] sm:$0x3] }
 0x1d2   : > { %2356 = vmatmul.mubr.msk.bf16.gmra.mxu1 %vm1746_vm7, %v1714_v50  ;;  %v1617_v56 = vsel %vm1601_vm0, %v1600_v44, %v1395_v49  ;;  %2384 = vmatprep.subr.msk.bf16.mxu1 %vm3618_vm14, %v1888_v7  ;;  %vm3619_vm0 = vmmov %vm3618_vm14 }
 0x1d3   : > { %v1634_v60 = vsel %vm1618_vm9, %v1617_v56, %v1419_v25  ;;  %v1921_v16 = vsel %vm3619_vm0, %v1888_v7, 0  ;;  %vm3621_vm9 = vmmov %vm3617_vm2 }
 0x1d4   : > { %v1483_v48 = vpop.permute.xlu0 %1482  ;;  %v1509_v57 = vpop.permute.xlu1 %1508  ;;  %2364 = vmatpush3.bf16.msra.mxu1 %v1921_v16 }
 0x1d8   : > { %v1441_v2 = vpop.permute.xlu0 %1440  ;;  %v1485_v40 = vpop.permute.xlu1 %1484 }
 0x1d9   : > { %v1648_v3 = vsel %vm3616_vm15, %v1632_v45, %v1441_v2 }
 0x1da   : > { %v1665_v14 = vsel %vm1651_vm10, %v1648_v3, %v1483_v48 }
 0x1db   : > { %v1682_v39 = vsel %vm1668_vm1, %v1665_v14, %v1507_v17 }
 0x1dc   : > { %v1531_v0 = vpop.permute.xlu0 %1530  ;;  %v1443_v21 = vpop.permute.xlu1 %1442 }
 0x1dd   : > { %v1650_v34 = vsel %vm3617_vm2, %v1634_v60, %v1443_v21  ;;  %v1699_v26 = vsel %vm1685_vm4, %v1682_v39, %v1531_v0 }
 0x1de   : > { %v1667_v12 = vsel %vm1651_vm10, %v1650_v34, %v1485_v40  ;;  %vm3622_vm10 = vmmov %vm3617_vm2 }
 0x1df   : > { %v1684_v4 = vsel %vm1668_vm1, %v1667_v12, %v1509_v57  ;;  %vm3623_vm1 = vmmov %vm3617_vm2 }
 0x1e0   : > { %v1573_v54 = vpop.permute.xlu0 %1572  ;;  %v1533_v43 = vpop.permute.xlu1 %1532  ;;  %vm3627_vm8 = vmmov %vm3623_vm1 }
 0x1e1   : > { %v1716_v35 = vsel %vm1702_vm5, %v1699_v26, %v1573_v54  ;;  %v1701_v9 = vsel %vm1685_vm4, %v1684_v4, %v1533_v43  ;;  %v3461_v54 = vld [vmem:[%s3557_s8] ss:$0 sm:$0xff]  ;;  %vm3624_vm4 = vmmov %vm3623_vm1 }
 0x1e2   : > { %2359 = vmatprep.mubr.msk.bf16.mxu1 %vm1746_vm7, %v1716_v35  ;;  %vm3628_vm11 = vmmov %vm3623_vm1 }
 0x1e3   : > { %vm3629_vm3 = vmmov %vm3623_vm1 }
 0x1e4   : > { %v1575_v61 = vpop.permute.xlu1 %1574  ;;  %vm3630_vm13 = vmmov %vm3623_vm1 }
 0x1e5   : > { %v1718_v38 = vsel %vm1702_vm5, %v1701_v9, %v1575_v61  ;;  %v2441_v9 = vld [vmem:[%s2610_s25 + $0x10] sm:$0xff]  ;;  %vm3625_vm5 = vmmov %vm3623_vm1 }
 0x1e6   : > { %2360 = vmatmul.mubr.msk.bf16.gmra.mxu1 %vm1746_vm7, %v1718_v38  ;;  %vm3626_vm7 = vmmov %vm3623_vm1 }
 0x1e7   : > { %vm3631_vm6 = vmmov %vm3623_vm1 }
 0x1e8   : > { %vm3632_vm15 = vmmov %vm3623_vm1 }
 0x1e9   : > { %vm3634_vm14 = vmmov %vm3623_vm1 }
 0x1ea   : > { %vm3635_vm0 = vmmov %vm3623_vm1 }
 0x252   : > { %v2349_v11 = vpop.f32.mrf.mxu1 }
 0x253   : > { %v1810_v59 = vadd.f32 %v2349_v11, %v2240_v62 }
 0x254   : > { %v1801_v28 = vpop.f32.mrf.mxu1 }
 0x255   : > { %v1802_v1 = vadd.f32 %v2240_v62, %v1801_v28  ;;  %v1866_v37 = vmax.f32 %v1810_v59, 0.0 }
 0x256   : > { %v2350_v15 = vpop.f32.mrf.mxu1 }
 0x257   : > { %v1813_v58 = vadd.f32 %v2350_v15, %v2240_v62  ;;  %v1864_v63 = vmax.f32 %v1802_v1, 0.0 }
 0x258   : > { %v1804_v10 = vpop.f32.mrf.mxu1 }
 0x259   : > { %v1805_v6 = vadd.f32 %v2240_v62, %v1804_v10  ;;  %v1867_v13 = vmax.f32 %v1813_v58, 0.0  ;;  %v2443_v10 = vld [vmem:[%s2610_s25 + $0x18] sm:$0xff] }
 0x25b   : > { %v1865_v18 = vmax.f32 %v1805_v6, 0.0  ;;  %v1881_v42 = vpack.c.bf16 %v1867_v13, %v1866_v37 }
 0x25d   : > { %v1880_v23 = vpack.c.bf16 %v1865_v18, %v1864_v63  ;;  %v2444_v18 = vld [vmem:[%s2610_s25 + $0x8] sm:$0xff] }
 0x25f   : > { %2365 = vmatprep.mubr.msk.bf16.mxu1 %vm1576_vm12, %v1880_v23 }
 0x260   : > { %2366 = vmatmul.mubr.msk.bf16.vlgmr.msra.gmra.mxu1 %vm1576_vm12, %v1881_v42 }
 0x272   : > { %v2353_v22 = vpop.f32.mrf.mxu1 }
 0x273   : > { %v1826_v30 = vadd.f32 %v2353_v22, %v2240_v62 }
 0x274   : > { %v1817_v24 = vpop.f32.mrf.mxu1 }
 0x275   : > { %v1818_v46 = vadd.f32 %v2240_v62, %v1817_v24  ;;  %v1870_v8 = vmax.f32 %v1826_v30, 0.0 }
 0x276   : > { %v2354_v41 = vpop.f32.mrf.mxu1 }
 0x277   : > { %v1829_v25 = vadd.f32 %v2354_v41, %v2240_v62  ;;  %v1868_v51 = vmax.f32 %v1818_v46, 0.0  ;;  %v2445_v41 = vld [vmem:[%s2610_s25 + $0x30] sm:$0xff] }
 0x278   : > { %v1820_v52 = vpop.f32.mrf.mxu1 }
 0x279   : > { %v1821_v31 = vadd.f32 %v2240_v62, %v1820_v52  ;;  %v1871_v47 = vmax.f32 %v1829_v25, 0.0 }
 0x27b   : > { %v1869_v49 = vmax.f32 %v1821_v31, 0.0  ;;  %v1883_v36 = vpack.c.bf16 %v1871_v47, %v1870_v8  ;;  %v2446_v31 = vld [vmem:[%s2610_s25 + $0x20] sm:$0xff] }
 0x27d   : > { %v1882_v19 = vpack.c.bf16 %v1869_v49, %v1868_v51 }
 0x27f   : > { %2369 = vmatprep.mubr.msk.bf16.mxu1 %vm1576_vm12, %v1882_v19  ;;  %v2447_v19 = vld [vmem:[%s2610_s25 + $0x38] sm:$0xff] }
 0x280   : > { %2370 = vmatmul.mubr.msk.bf16.gmra.mxu1 %vm1576_vm12, %v1883_v36 }
 0x292   : > { %v2357_v27 = vpop.f32.mrf.mxu1 }
 0x293   : > { %v1842_v32 = vadd.f32 %v2357_v27, %v2240_v62 }
 0x294   : > { %v1833_v17 = vpop.f32.mrf.mxu1 }
 0x295   : > { %v1834_v33 = vadd.f32 %v2240_v62, %v1833_v17  ;;  %v1874_v20 = vmax.f32 %v1842_v32, 0.0 }
 0x296   : > { %v2358_v5 = vpop.f32.mrf.mxu1 }
 0x297   : > { %v1845_v29 = vadd.f32 %v2358_v5, %v2240_v62  ;;  %v1872_v48 = vmax.f32 %v1834_v33, 0.0  ;;  %v2448_v5 = vld [vmem:[%s2610_s25 + $0x28] sm:$0xff] }
 0x298   : > { %v1836_v53 = vpop.f32.mrf.mxu1 }
 0x299   : > { %v1837_v50 = vadd.f32 %v2240_v62, %v1836_v53  ;;  %v1875_v55 = vmax.f32 %v1845_v29, 0.0 }
 0x29b   : > { %v1873_v57 = vmax.f32 %v1837_v50, 0.0  ;;  %v1885_v45 = vpack.c.bf16 %v1875_v55, %v1874_v20  ;;  %v2449_v55 = vld [vmem:[%s2610_s25 + $0x50] sm:$0xff] }
 0x29d   : > { %v1884_v44 = vpack.c.bf16 %v1873_v57, %v1872_v48 }
 0x29f   : > { %2373 = vmatprep.mubr.msk.bf16.mxu1 %vm1576_vm12, %v1884_v44 }
 0x2a0   : > { %2374 = vmatmul.mubr.msk.bf16.gmra.mxu1 %vm1576_vm12, %v1885_v45  ;;  %v2450_v45 = vld [vmem:[%s2610_s25 + $0x40] sm:$0xff] }
 0x2a6   : > { %v2361_v2 = vpop.f32.mrf.mxu1 }
 0x2a7   : > { %v1858_v0 = vadd.f32 %v2361_v2, %v2240_v62 }
 0x2a8   : > { %v1849_v40 = vpop.f32.mrf.mxu1 }
 0x2a9   : > { %v1850_v3 = vadd.f32 %v2240_v62, %v1849_v40  ;;  %v1878_v12 = vmax.f32 %v1858_v0, 0.0 }
 0x2aa   : > { %v2362_v56 = vpop.f32.mrf.mxu1 }
 0x2ab   : > { %v1861_v14 = vadd.f32 %v2362_v56, %v2240_v62  ;;  %v1876_v34 = vmax.f32 %v1850_v3, 0.0 }
 0x2ac   : > { %v1852_v60 = vpop.f32.mrf.mxu1 }
 0x2ad   : > { %v1853_v21 = vadd.f32 %v2240_v62, %v1852_v60  ;;  %v1879_v39 = vmax.f32 %v1861_v14, 0.0  ;;  %v2442_v62 = vld [vmem:[%s2610_s25] sm:$0xff]  ;;  %v2451_v14 = vld [vmem:[%s2610_s25 + $0x58] sm:$0xff] }
 0x2af   : > { %v1877_v7 = vmax.f32 %v1853_v21, 0.0  ;;  %v1887_v26 = vpack.c.bf16 %v1879_v39, %v1878_v12  ;;  %v2452_v39 = vld [vmem:[%s2610_s25 + $0x48] sm:$0xff] }
 0x2b1   : > { %v1886_v16 = vpack.c.bf16 %v1877_v7, %v1876_v34 }
 0x2b3   : > { %2377 = vmatprep.mubr.msk.bf16.mxu1 %vm1576_vm12, %v1886_v16 }
 0x2b4   : > { %2378 = vmatmul.mubr.msk.bf16.gmra.mxu1 %vm1576_vm12, %v1887_v26  ;;  %vm3620_vm12 = vmmov %vm3617_vm2 }
 0x2b5   : > { %vm3633_vm2 = vmmov %vm3623_vm1 }
 0x320   : > { %v2367_v43 = vpop.f32.mrf.mxu1 }
 0x321   : > { %v1966_v35 = vadd.f32 %v2367_v43, %v3461_v54  ;;  %v2453_v43 = vld [vmem:[%s2610_s25 + $0x70] sm:$0xff] }
 0x322   : > { %v1957_v4 = vpop.f32.mrf.mxu1 }
 0x323   : > { %v2022_v61 = vadd.f32 %v2441_v9, %v1966_v35  ;;  %v1958_v38 = vadd.f32 %v3461_v54, %v1957_v4 }
 0x324   : > { %v2368_v11 = vpop.f32.mrf.mxu1 }
 0x325   : > { %v2038_v28 = vmax.f32 %v2022_v61, 0.0  ;;  %v2020_v15 = vadd.f32 %v2442_v62, %v1958_v38  ;;  %v1969_v1 = vadd.f32 %v2368_v11, %v3461_v54  ;;  %v2454_v38 = vld [vmem:[%s2610_s25 + $0x60] sm:$0xff] }
 0x326   : > { %v1960_v58 = vpop.f32.mrf.mxu1 }
 0x327   : > { %2054 = vst.msk [vmem:[%s3471_s10 + $0x10] sm:$0xff] %vm3620_vm12, %v2038_v28  ;;  %v2036_v59 = vmax.f32 %v2020_v15, 0.0  ;;  %v2023_v6 = vadd.f32 %v2443_v10, %v1969_v1  ;;  %v1961_v13 = vadd.f32 %v3461_v54, %v1960_v58  ;;  %v2455_v1 = vld [vmem:[%s2610_s25 + $0x78] sm:$0xff] }
 0x329   : > { %2052 = vst.msk [vmem:[%s3471_s10] sm:$0xff] %vm3621_vm9, %v2036_v59  ;;  %v2039_v63 = vmax.f32 %v2023_v6, 0.0  ;;  %v2021_v37 = vadd.f32 %v2444_v18, %v1961_v13  ;;  %v2456_v6 = vld [vmem:[%s2610_s25 + $0x68] sm:$0xff] }
 0x32b   : > { %2055 = vst.msk [vmem:[%s3471_s10 + $0x18] sm:$0xff] %vm3622_vm10, %v2039_v63  ;;  %v2037_v23 = vmax.f32 %v2021_v37, 0.0 }
 0x32d   : > { %2053 = vst.msk [vmem:[%s3471_s10 + $0x8] sm:$0xff] %vm3623_vm1, %v2037_v23 }
 0x340   : > { %v2371_v42 = vpop.f32.mrf.mxu1 }
 0x341   : > { %v1982_v22 = vadd.f32 %v2371_v42, %v3461_v54 }
 0x342   : > { %v1973_v24 = vpop.f32.mrf.mxu1 }
 0x343   : > { %v2026_v46 = vadd.f32 %v2445_v41, %v1982_v22  ;;  %v1974_v25 = vadd.f32 %v3461_v54, %v1973_v24 }
 0x344   : > { %v2372_v30 = vpop.f32.mrf.mxu1 }
 0x345   : > { %v2042_v52 = vmax.f32 %v2026_v46, 0.0  ;;  %v2024_v47 = vadd.f32 %v2446_v31, %v1974_v25  ;;  %v1985_v51 = vadd.f32 %v2372_v30, %v3461_v54 }
 0x346   : > { %v1976_v49 = vpop.f32.mrf.mxu1 }
 0x347   : > { %2058 = vst.msk [vmem:[%s3471_s10 + $0x30] sm:$0xff] %vm3624_vm4, %v2042_v52  ;;  %v2040_v8 = vmax.f32 %v2024_v47, 0.0  ;;  %v2027_v36 = vadd.f32 %v2447_v19, %v1985_v51  ;;  %v1977_v27 = vadd.f32 %v3461_v54, %v1976_v49 }
 0x349   : > { %2056 = vst.msk [vmem:[%s3471_s10 + $0x20] sm:$0xff] %vm3625_vm5, %v2040_v8  ;;  %v2043_v17 = vmax.f32 %v2027_v36, 0.0  ;;  %v2025_v33 = vadd.f32 %v2448_v5, %v1977_v27 }
 0x34b   : > { %2059 = vst.msk [vmem:[%s3471_s10 + $0x38] sm:$0xff] %vm3626_vm7, %v2043_v17  ;;  %v2041_v29 = vmax.f32 %v2025_v33, 0.0 }
 0x34d   : > { %2057 = vst.msk [vmem:[%s3471_s10 + $0x28] sm:$0xff] %vm3627_vm8, %v2041_v29 }
 0x360   : > { %v2375_v32 = vpop.f32.mrf.mxu1 }
 0x361   : > { %v1998_v53 = vadd.f32 %v2375_v32, %v3461_v54 }
 0x362   : > { %v1989_v50 = vpop.f32.mrf.mxu1 }
 0x363   : > { %v2030_v48 = vadd.f32 %v2449_v55, %v1998_v53  ;;  %v1990_v57 = vadd.f32 %v3461_v54, %v1989_v50 }
 0x364   : > { %v2376_v20 = vpop.f32.mrf.mxu1 }
 0x365   : > { %v2046_v44 = vmax.f32 %v2030_v48, 0.0  ;;  %v2028_v2 = vadd.f32 %v2450_v45, %v1990_v57  ;;  %v2001_v40 = vadd.f32 %v2376_v20, %v3461_v54 }
 0x366   : > { %v1992_v56 = vpop.f32.mrf.mxu1 }
 0x367   : > { %2062 = vst.msk [vmem:[%s3471_s10 + $0x50] sm:$0xff] %vm3628_vm11, %v2046_v44  ;;  %v2044_v3 = vmax.f32 %v2028_v2, 0.0  ;;  %v2031_v0 = vadd.f32 %v2451_v14, %v2001_v40  ;;  %v1993_v60 = vadd.f32 %v3461_v54, %v1992_v56 }
 0x369   : > { %2060 = vst.msk [vmem:[%s3471_s10 + $0x40] sm:$0xff] %vm3629_vm3, %v2044_v3  ;;  %v2047_v21 = vmax.f32 %v2031_v0, 0.0  ;;  %v2029_v34 = vadd.f32 %v2452_v39, %v1993_v60 }
 0x36b   : > { %2063 = vst.msk [vmem:[%s3471_s10 + $0x58] sm:$0xff] %vm3630_vm13, %v2047_v21  ;;  %v2045_v7 = vmax.f32 %v2029_v34, 0.0 }
 0x36d   : > { %2061 = vst.msk [vmem:[%s3471_s10 + $0x48] sm:$0xff] %vm3631_vm6, %v2045_v7 }
 0x374   : > { %v2379_v12 = vpop.f32.mrf.mxu1 }
 0x375   : > { %v2014_v16 = vadd.f32 %v2379_v12, %v3461_v54 }
 0x376   : > { %v2005_v26 = vpop.f32.mrf.mxu1 }
 0x377   : > { %v2034_v35 = vadd.f32 %v2453_v43, %v2014_v16  ;;  %v2006_v4 = vadd.f32 %v3461_v54, %v2005_v26 }
 0x378   : > { %v2380_v9 = vpop.f32.mrf.mxu1 }
 0x379   : > { %v2050_v61 = vmax.f32 %v2034_v35, 0.0  ;;  %v2032_v11 = vadd.f32 %v2454_v38, %v2006_v4  ;;  %v2017_v28 = vadd.f32 %v2380_v9, %v3461_v54 }
 0x37a   : > { %v2008_v62 = vpop.f32.mrf.mxu1 }
 0x37b   : > { %2066 = vst.msk [vmem:[%s3471_s10 + $0x70] sm:$0xff] %vm3632_vm15, %v2050_v61  ;;  %v2048_v15 = vmax.f32 %v2032_v11, 0.0  ;;  %v2035_v58 = vadd.f32 %v2455_v1, %v2017_v28  ;;  %v2009_v59 = vadd.f32 %v3461_v54, %v2008_v62 }
 0x37d   : > { %2064 = vst.msk [vmem:[%s3471_s10 + $0x60] sm:$0xff] %vm3633_vm2, %v2048_v15  ;;  %v2051_v10 = vmax.f32 %v2035_v58, 0.0  ;;  %v2033_v13 = vadd.f32 %v2456_v6, %v2009_v59 }
 0x37f   : > { %2067 = vst.msk [vmem:[%s3471_s10 + $0x78] sm:$0xff] %vm3634_vm14, %v2051_v10  ;;  %v2049_v63 = vmax.f32 %v2033_v13, 0.0 }
 0x381   : > { %2065 = vst.msk [vmem:[%s3471_s10 + $0x68] sm:$0xff] %vm3635_vm0, %v2049_v63 }
 0x382 PF: > { %s19_s13 = sadd.s32 1, %s2495_s13   ;;  %s3636_s30 = smov %s2487_s11 }
 0x383   : > { %p16_p8 = scmp.ge.s32.totalorder %s19_s13, 6   ;;  %s3637_s10 = smov %s2491_s12 }
 0x384   : > { %s3638_s11 = smov %s3641_s14  ;;  %s3639_s12 = smov %s3645_s15 }
 0x385   :  { %18 = sbr.rel (!%p16_p8) target bundleno = 3 (0x3), region = 92 }

</bundles_post_ra>
